<compile_context>
chip_gen: v5e
topology: v5e:2x2
jax: 0.10.0
libtpu: 0.0.40
codegen_flags: <defaults>
</compile_context>

<pallas_src>
import functools

import jax
import jax.numpy as jnp
from jax.experimental import pallas as pl
from jax.experimental.pallas import tpu as pltpu

# 27 kernel offsets of the 3x3x3 sparse conv (dilation=1, stride=1).
OFFSETS = [(dx, dy, dz) for dx in (-1, 0, 1) for dy in (-1, 0, 1) for dz in (-1, 0, 1)]


def _round_up(x, m):
    return ((x + m - 1) // m) * m


# ------------------------------------------------------------------ kernels

def _conv_kernel(xs_ref, w_ref, occ_ref, o_ref):
    """Single fused contraction: o = (x_fused @ W_fused) * occupied.

    xs_ref: (tv, 27*Cin) bf16, w_ref: (27*Cin, Cpad) bf16 (VMEM-resident),
    occ_ref: (tv, 1) f32, o_ref: (tv, Cpad) f32.
    """
    acc = jnp.dot(xs_ref[...], w_ref[...], preferred_element_type=jnp.float32)
    o_ref[...] = acc * occ_ref[...]


def _point_transform_kernel(devox_ref, f_ref, w_ref, b_ref, o_ref):
    """out = devox + z.F @ W + b  (the point_transforms Linear + residual)."""
    o_ref[...] = (devox_ref[...]
                  + jnp.dot(f_ref[...], w_ref[...],
                            preferred_element_type=jnp.float32)
                  + b_ref[...])


# ------------------------------------------------------------ pallas wrappers

def sparse_conv3d_pallas(shifted_fused, conv_w_fused, occupied, *, tv=1024):
    """shifted_fused: (V, 27*Cin) bf16; conv_w_fused: (27*Cin, Cpad) bf16;
    occupied: (V, 1) f32.  Returns (V, Cpad) f32."""
    V, kcin = shifted_fused.shape
    cpad = conv_w_fused.shape[-1]

    tv = min(tv, _round_up(V, 8))          # tile rows, multiple of 8 sublanes
    v_pad = _round_up(V, tv)
    if v_pad != V:
        shifted_fused = jnp.pad(shifted_fused, ((0, v_pad - V), (0, 0)))
        occupied = jnp.pad(occupied, ((0, v_pad - V), (0, 0)))

    out = pl.pallas_call(
        _conv_kernel,
        out_shape=jax.ShapeDtypeStruct((v_pad, cpad), jnp.float32),
        grid_spec=pltpu.PrefetchScalarGridSpec(
            num_scalar_prefetch=0,
            grid=(v_pad // tv,),
            in_specs=[
                pl.BlockSpec((tv, kcin), lambda i: (i, 0)),
                pl.BlockSpec((kcin, cpad), lambda i: (0, 0)),   # VMEM-resident
                pl.BlockSpec((tv, 1), lambda i: (i, 0)),
            ],
            out_specs=pl.BlockSpec((tv, cpad), lambda i: (i, 0)),
        ),
        compiler_params=pltpu.CompilerParams(
            dimension_semantics=("parallel",)),
    )(shifted_fused, conv_w_fused, occupied)
    return out[:V]


def point_transform_add_pallas(devox, feats, lin_w, lin_b, *, tn=1024):
    """devox: (N, Cpad) f32, feats: (N, Cin) f32, lin_w: (Cin, Cpad),
    lin_b: (1, Cpad).  Returns (N, Cpad) f32."""
    N, cpad = devox.shape
    cin = feats.shape[-1]

    tn = min(tn, _round_up(N, 8))
    n_pad = _round_up(N, tn)
    if n_pad != N:
        devox = jnp.pad(devox, ((0, n_pad - N), (0, 0)))
        feats = jnp.pad(feats, ((0, n_pad - N), (0, 0)))

    out = pl.pallas_call(
        _point_transform_kernel,
        out_shape=jax.ShapeDtypeStruct((n_pad, cpad), jnp.float32),
        grid_spec=pltpu.PrefetchScalarGridSpec(
            num_scalar_prefetch=0,
            grid=(n_pad // tn,),
            in_specs=[
                pl.BlockSpec((tn, cpad), lambda i: (i, 0)),
                pl.BlockSpec((tn, cin), lambda i: (i, 0)),
                pl.BlockSpec((cin, cpad), lambda i: (0, 0)),    # VMEM-resident
                pl.BlockSpec((1, cpad), lambda i: (0, 0)),      # VMEM-resident
            ],
            out_specs=pl.BlockSpec((tn, cpad), lambda i: (i, 0)),
        ),
        compiler_params=pltpu.CompilerParams(
            dimension_semantics=("parallel",)),
    )(devox, feats, lin_w, lin_b)
    return out[:N]


# ------------------------------------------------------------------ JAX glue

def initial_voxelize(pc_float, batch_idx, feats, B, D):
    """Average point features into voxels (torchsparse initial_voxelize)."""
    c = jnp.clip(jnp.floor(pc_float).astype(jnp.int32), 0, D - 1)
    flat = batch_idx * D * D * D + c[:, 0] * D * D + c[:, 1] * D + c[:, 2]
    V = B * D * D * D
    sums = jnp.zeros((V, feats.shape[1]), jnp.float32).at[flat].add(feats)
    counts = jnp.zeros((V,), jnp.float32).at[flat].add(1.0)
    occupied = (counts > 0).astype(jnp.float32)[:, None]          # (V, 1)
    avg = sums / jnp.maximum(counts, 1.0)[:, None]
    return avg, occupied


def build_shifted_fused(grid):
    """grid: (B, D, D, D, C) -> (V, 27*C) zero-padded neighbor features,
    column block k*C:(k+1)*C holds the features of offset OFFSETS[k]."""
    # TODO(synk): replace this 27x HBM materialization with in-kernel halo-slab
    # tiling (manual make_async_copy of a (tile+halo) grid slab) to cut input
    # HBM traffic ~27x at production grid sizes.
    B, D, _, _, C = grid.shape
    pad = jnp.pad(grid, ((0, 0), (1, 1), (1, 1), (1, 1), (0, 0)))
    cols = []
    for (dx, dy, dz) in OFFSETS:
        sl = pad[:, 1 + dx:1 + dx + D, 1 + dy:1 + dy + D, 1 + dz:1 + dz + D, :]
        cols.append(sl.reshape(-1, C))
    return jnp.concatenate(cols, axis=-1)                          # (V, 27*C)


def trilinear_devoxelize(vox_flat, pc_float, batch_idx, D):
    """voxel_to_point(nearest=False): 8-corner trilinear interpolation."""
    # TODO(synk): data-dependent 8-corner gather stays in plain JAX (would need
    # a scalar-prefetch / manual-DMA row-gather kernel).
    c0 = jnp.floor(pc_float).astype(jnp.int32)
    frac = pc_float - c0.astype(jnp.float32)
    N = pc_float.shape[0]
    out = jnp.zeros((N, vox_flat.shape[1]), jnp.float32)
    for dx in (0, 1):
        for dy in (0, 1):
            for dz in (0, 1):
                cc = c0 + jnp.array([dx, dy, dz], jnp.int32)
                w = ((frac[:, 0] if dx else 1.0 - frac[:, 0])
                     * (frac[:, 1] if dy else 1.0 - frac[:, 1])
                     * (frac[:, 2] if dz else 1.0 - frac[:, 2]))
                valid = jnp.all((cc >= 0) & (cc < D), axis=1).astype(jnp.float32)
                flat = (batch_idx * D * D * D
                        + cc[:, 0] * D * D + cc[:, 1] * D + cc[:, 2])
                flat = jnp.clip(flat, 0, vox_flat.shape[0] - 1)
                out = out + vox_flat[flat] * (w * valid)[:, None]
    return out


def sconv3d_forward(coords, feats, params, *, pres, vres, B, D):
    """Full SConv3d.forward.  coords: (N, 4) float [x, y, z, batch]; feats: (N, Cin)."""
    pc_float = coords[:, :3] * pres / vres            # voxel-space float coords
    batch_idx = coords[:, 3].astype(jnp.int32)
    cin = feats.shape[1]
    cout = params["conv_w"].shape[-1]
    cpad = _round_up(cout, 128)                       # lane-dense output width

    # x = initial_voxelize(z, pres, vres)
    vox_feat, occupied = initial_voxelize(pc_float, batch_idx, feats, B, D)
    grid = vox_feat.reshape(B, D, D, D, cin)

    # x = self.net(x)   -- 3x3x3 sparse conv as one fused (V,27*Cin)@(27*Cin,Cpad)
    # matmul; output only at occupied voxels (mask fused into the kernel),
    # contributions only from occupied neighbors (empty voxels carry zeros).
    shifted = build_shifted_fused(grid)                               # (V, 27*Cin)
    conv_w = params["conv_w"].reshape(27 * cin, cout)                 # row k*Cin+c
    conv_w = jnp.pad(conv_w, ((0, 0), (0, cpad - cout)))              # (27*Cin, Cpad)
    conv_out = sparse_conv3d_pallas(shifted.astype(jnp.bfloat16),
                                    conv_w.astype(jnp.bfloat16),
                                    occupied)                         # (V, Cpad) f32

    # out = voxel_to_point(x, z, nearest=False)
    devox = trilinear_devoxelize(conv_out, pc_float, batch_idx, D)    # (N, Cpad)

    # out.F = out.F + self.point_transforms(z.F)
    lin_w = jnp.pad(params["lin_w"], ((0, 0), (0, cpad - cout)))
    lin_b = jnp.pad(params["lin_b"], ((0, 0), (0, cpad - cout)))
    out = point_transform_add_pallas(devox, feats, lin_w, lin_b)      # (N, Cpad)
    return out[:, :cout]


# ------------------------------------------------------------- pure-JAX reference

def reference_forward(coords, feats, params, *, pres, vres, B, D):
    pc_float = coords[:, :3] * pres / vres
    batch_idx = coords[:, 3].astype(jnp.int32)
    cin = feats.shape[1]
    cout = params["conv_w"].shape[-1]
    vox_feat, occupied = initial_voxelize(pc_float, batch_idx, feats, B, D)
    grid = vox_feat.reshape(B, D, D, D, cin)
    shifted = build_shifted_fused(grid)
    conv_out = shifted @ params["conv_w"].reshape(27 * cin, cout)
    conv_out = conv_out * occupied
    devox = trilinear_devoxelize(conv_out, pc_float, batch_idx, D)
    return devox + feats @ params["lin_w"] + params["lin_b"]


# ----------------------------------------------------------------------- main

if __name__ == "__main__":
    INC, OUTC = 4, 8
    B, D = 2, 8            # 2 batches, 8^3 voxel grid  (V = 1024)
    N = 256                # points
    PRES, VRES = 1.0, 1.0

    key = jax.random.PRNGKey(0)
    k_xyz, k_feat, k_cw, k_lw, k_lb = jax.random.split(key, 5)

    xyz = jax.random.uniform(k_xyz, (N, 3), jnp.float32,
                             minval=0.5, maxval=D - 1.5)
    batch = jnp.concatenate([jnp.zeros((N // 2,), jnp.float32),
                             jnp.ones((N - N // 2,), jnp.float32)])
    coords = jnp.concatenate([xyz, batch[:, None]], axis=1)     # (N, 4)
    feats = jax.random.normal(k_feat, (N, INC), jnp.float32)    # z.F

    params = {
        # spnn.Conv3d(inc, outc, ks=3): weight per kernel offset, (27, Cin, Cout)
        "conv_w": jax.random.normal(k_cw, (27, INC, OUTC), jnp.float32) * 0.1,
        # nn.Linear(inc, outc): W stored (Cin, Cout) so out = F @ W + b
        "lin_w": jax.random.normal(k_lw, (INC, OUTC), jnp.float32) * 0.1,
        "lin_b": jax.random.normal(k_lb, (1, OUTC), jnp.float32) * 0.1,
    }

    fwd = jax.jit(functools.partial(sconv3d_forward,
                                    pres=PRES, vres=VRES, B=B, D=D))
    out = fwd(coords, feats, params)
    jax.block_until_ready(out)
    assert out.shape == (N, OUTC) and out.dtype == jnp.float32

    ref = reference_forward(coords, feats, params, pres=PRES, vres=VRES, B=B, D=D)
    assert bool(jnp.allclose(out, ref, rtol=5e-2, atol=5e-2)), "mismatch vs reference"
    print("KERNEL_OK")
</pallas_src>

<mosaic_0001>
module attributes {stable_mosaic.version = 11 : i64} {
  func.func @_conv_kernel(%arg0: i32, %arg1: memref<1024x108xbf16, #tpu.memory_space<vmem>>, %arg2: memref<108x128xbf16, #tpu.memory_space<vmem>>, %arg3: memref<1024x1xf32, #tpu.memory_space<vmem>>, %arg4: memref<1024x128xf32, #tpu.memory_space<vmem>>) attributes {dimension_semantics = [#tpu.dimension_semantics<parallel>], iteration_bounds = array<i64: 1>, scalar_prefetch = 0 : i64, scratch_operands = 0 : i64, tpu.core_type = #tpu.core_type<tc>, window_params = [{transform_indices = @transform_0, window_bounds = array<i64: 1024, 108>}, {pipeline_mode = #tpu.pipeline_mode<synchronous>, transform_indices = @transform_1, window_bounds = array<i64: 108, 128>}, {transform_indices = @transform_2, window_bounds = array<i64: 1024, 1>}, {transform_indices = @transform_3, window_bounds = array<i64: 1024, 128>}]} {
    %c0 = arith.constant 0 : index
    %c0_0 = arith.constant 0 : index
    %0 = vector.load %arg1[%c0, %c0_0] : memref<1024x108xbf16, #tpu.memory_space<vmem>>, vector<1024x108xbf16>
    %c0_1 = arith.constant 0 : index
    %c0_2 = arith.constant 0 : index
    %1 = vector.load %arg2[%c0_1, %c0_2] : memref<108x128xbf16, #tpu.memory_space<vmem>>, vector<108x128xbf16>
    %cst = arith.constant dense<0.000000e+00> : vector<1024x128xf32>
    %2 = tpu.matmul %0, %1, %cst {dimension_numbers = #tpu.dot_dimension_numbers<[1], [0], [0], [1], [0, 0, 1, 1], [], []>} : vector<1024x108xbf16>, vector<108x128xbf16>, vector<1024x128xf32> -> vector<1024x128xf32>
    %c0_3 = arith.constant 0 : index
    %c0_4 = arith.constant 0 : index
    %3 = vector.load %arg3[%c0_3, %c0_4] : memref<1024x1xf32, #tpu.memory_space<vmem>>, vector<1024x1xf32>
    %4 = vector.broadcast %3 : vector<1024x1xf32> to vector<1024x128xf32>
    %5 = arith.mulf %2, %4 : vector<1024x128xf32>
    %c0_5 = arith.constant 0 : index
    %c0_6 = arith.constant 0 : index
    %6 = vector.load %arg4[%c0_5, %c0_6] : memref<1024x128xf32, #tpu.memory_space<vmem>>, vector<1024x128xf32>
    tpu.vector_store %arg4[%c0_5, %c0_6], %5 {strides = array<i32>} : memref<1024x128xf32, #tpu.memory_space<vmem>>, vector<1024x128xf32>,
    return
  }
  func.func @transform_0(%arg0: i32) -> (i32, i32) {
    %c0_i32 = arith.constant 0 : i32
    %c0_i32_0 = arith.constant 0 : i32
    return %arg0, %c0_i32 : i32, i32
  }
  func.func @transform_1(%arg0: i32) -> (i32, i32) {
    %c0_i32 = arith.constant 0 : i32
    %c0_i32_0 = arith.constant 0 : i32
    %c0_i32_1 = arith.constant 0 : i32
    return %c0_i32, %c0_i32_0 : i32, i32
  }
  func.func @transform_2(%arg0: i32) -> (i32, i32) {
    %c0_i32 = arith.constant 0 : i32
    %c0_i32_0 = arith.constant 0 : i32
    return %arg0, %c0_i32 : i32, i32
  }
  func.func @transform_3(%arg0: i32) -> (i32, i32) {
    %c0_i32 = arith.constant 0 : i32
    %c0_i32_0 = arith.constant 0 : i32
    return %arg0, %c0_i32 : i32, i32
  }
}

module attributes {stable_mosaic.version = 11 : i64} {
  func.func @_point_transform_kernel(%arg0: i32, %arg1: memref<256x128xf32, #tpu.memory_space<vmem>>, %arg2: memref<256x4xf32, #tpu.memory_space<vmem>>, %arg3: memref<4x128xf32, #tpu.memory_space<vmem>>, %arg4: memref<1x128xf32, #tpu.memory_space<vmem>>, %arg5: memref<256x128xf32, #tpu.memory_space<vmem>>) attributes {dimension_semantics = [#tpu.dimension_semantics<parallel>], iteration_bounds = array<i64: 1>, scalar_prefetch = 0 : i64, scratch_operands = 0 : i64, tpu.core_type = #tpu.core_type<tc>, window_params = [{transform_indices = @transform_0, window_bounds = array<i64: 256, 128>}, {transform_indices = @transform_1, window_bounds = array<i64: 256, 4>}, {pipeline_mode = #tpu.pipeline_mode<synchronous>, transform_indices = @transform_2, window_bounds = array<i64: 4, 128>}, {pipeline_mode = #tpu.pipeline_mode<synchronous>, transform_indices = @transform_3, window_bounds = array<i64: 1, 128>}, {transform_indices = @transform_4, window_bounds = array<i64: 256, 128>}]} {
    %c0 = arith.constant 0 : index
    %c0_0 = arith.constant 0 : index
    %0 = vector.load %arg1[%c0, %c0_0] : memref<256x128xf32, #tpu.memory_space<vmem>>, vector<256x128xf32>
    %c0_1 = arith.constant 0 : index
    %c0_2 = arith.constant 0 : index
    %1 = vector.load %arg2[%c0_1, %c0_2] : memref<256x4xf32, #tpu.memory_space<vmem>>, vector<256x4xf32>
    %c0_3 = arith.constant 0 : index
    %c0_4 = arith.constant 0 : index
    %2 = vector.load %arg3[%c0_3, %c0_4] : memref<4x128xf32, #tpu.memory_space<vmem>>, vector<4x128xf32>
    %cst = arith.constant dense<0.000000e+00> : vector<256x128xf32>
    %3 = tpu.matmul %1, %2, %cst {dimension_numbers = #tpu.dot_dimension_numbers<[1], [0], [0], [1], [0, 0, 1, 1], [], []>} : vector<256x4xf32>, vector<4x128xf32>, vector<256x128xf32> -> vector<256x128xf32>
    %4 = arith.addf %0, %3 : vector<256x128xf32>
    %c0_5 = arith.constant 0 : index
    %c0_6 = arith.constant 0 : index
    %5 = vector.load %arg4[%c0_5, %c0_6] : memref<1x128xf32, #tpu.memory_space<vmem>>, vector<1x128xf32>
    %6 = vector.broadcast %5 : vector<1x128xf32> to vector<256x128xf32>
    %7 = arith.addf %4, %6 : vector<256x128xf32>
    %c0_7 = arith.constant 0 : index
    %c0_8 = arith.constant 0 : index
    %8 = vector.load %arg5[%c0_7, %c0_8] : memref<256x128xf32, #tpu.memory_space<vmem>>, vector<256x128xf32>
    tpu.vector_store %arg5[%c0_7, %c0_8], %7 {strides = array<i32>} : memref<256x128xf32, #tpu.memory_space<vmem>>, vector<256x128xf32>,
    return
  }
  func.func @transform_0(%arg0: i32) -> (i32, i32) {
    %c0_i32 = arith.constant 0 : i32
    %c0_i32_0 = arith.constant 0 : i32
    return %arg0, %c0_i32 : i32, i32
  }
  func.func @transform_1(%arg0: i32) -> (i32, i32) {
    %c0_i32 = arith.constant 0 : i32
    %c0_i32_0 = arith.constant 0 : i32
    return %arg0, %c0_i32 : i32, i32
  }
  func.func @transform_2(%arg0: i32) -> (i32, i32) {
    %c0_i32 = arith.constant 0 : i32
    %c0_i32_0 = arith.constant 0 : i32
    %c0_i32_1 = arith.constant 0 : i32
    return %c0_i32, %c0_i32_0 : i32, i32
  }
  func.func @transform_3(%arg0: i32) -> (i32, i32) {
    %c0_i32 = arith.constant 0 : i32
    %c0_i32_0 = arith.constant 0 : i32
    %c0_i32_1 = arith.constant 0 : i32
    return %c0_i32, %c0_i32_0 : i32, i32
  }
  func.func @transform_4(%arg0: i32) -> (i32, i32) {
    %c0_i32 = arith.constant 0 : i32
    %c0_i32_0 = arith.constant 0 : i32
    return %arg0, %c0_i32 : i32, i32
  }
}

</mosaic_0001>

<bundles_post_ra>
// kernel: sconv3d_forward.2
= control target key start
LH: loop header
LB: loop body
LE: loop exit
PB: predicated region body
PF: predicated region fallthrough
CT: control target
= control target key end

     0   :  { %v2516_v0 = vmov 0   ;;  %vm711_vm0 = vcmask 1045504   ;;  %vm518_vm1 = vcmask 883712   ;;  %s3909_s2 = inlined_call_operand.vmem [shape: f32[1024,1], index: 2, kind: input, shape index: {}]   ;;  %s3910_s1 = inlined_call_operand.vmem [shape: bf16[108,128], index: 1, kind: input, shape index: {}]   ;;  %s3911_s0 = inlined_call_operand.vmem [shape: bf16[1024,108], index: 0, kind: input, shape index: {}]   ;;  %s3912_s3 = inlined_call_operand.vmem [shape: f32[1024,128], index: 3, kind: output, shape index: {}]  }
   0x1   :  { %2515 = vset.pattern.permute.xlu2 %v2516_v0  ;;  %2514 = vset.pattern.permute.xlu1 %v2516_v0  ;;  %v1048_v1 = vld [vmem:[%s3909_s2 + $0x20] sm:$0xff]  ;;  %v1046_v2 = vld [vmem:[%s3909_s2 + $0x10] sm:$0xff]  ;;  %v2489_v8 = vld [vmem:[%s3910_s1 + $0x28] sm:$0xff] }
   0x2   :  { %v1044_v3 = vld [vmem:[%s3909_s2] sm:$0xff]  ;;  %2513 = vset.pattern.permute.xlu0 %v2516_v0  ;;  %1194 = vperm.xlu2 %2515, %v1048_v1   ;;  %v2354_v4 = vld [vmem:[%s3910_s1 + $0x30] sm:$0xf]  ;;  %v2490_v5 = vld [vmem:[%s3910_s1 + $0x30] sm:$0x30] }
   0x3   :  { %1184 = vperm.xlu1 %2514, %v1046_v2   ;;  %1174 = vperm.xlu0 %2513, %v1044_v3   ;;  %v2355_v6 = vor.u32 %v2490_v5, %v2354_v4  ;;  %v1049_v9 = vld [vmem:[%s3909_s2 + $0x28] sm:$0xff]  ;;  %v1047_v10 = vld [vmem:[%s3909_s2 + $0x18] sm:$0xff]  ;;  %v2488_v12 = vld [vmem:[%s3910_s1 + $0x20] sm:$0xff] }
   0x4   :  { %v1045_v11 = vld [vmem:[%s3909_s2 + $0x8] sm:$0xff]  ;;  %v2487_v13 = vld [vmem:[%s3910_s1 + $0x18] sm:$0xff]  ;;  %v1052_v14 = vld [vmem:[%s3909_s2 + $0x40] sm:$0xff] }
   0x5   :  { %v713_v7 = vsel %vm711_vm0, %v2355_v6, 0  ;;  %v1051_v15 = vld [vmem:[%s3909_s2 + $0x38] sm:$0xff]  ;;  %v1050_v16 = vld [vmem:[%s3909_s2 + $0x30] sm:$0xff]  ;;  %v2485_v18 = vld [vmem:[%s3910_s1 + $0x8] sm:$0xff] }
   0x6   :  { %716 = vmatpush.bf16.msra.mxu0 %v713_v7  ;;  %2491 = vmatpush.bf16.msra.mxu1 %v713_v7  ;;  %v2486_v17 = vld [vmem:[%s3910_s1 + $0x10] sm:$0xff]  ;;  %v1055_v19 = vld [vmem:[%s3909_s2 + $0x58] sm:$0xff]  ;;  %v1053_v21 = vld [vmem:[%s3909_s2 + $0x48] sm:$0xff] }
   0x7   :  { %2492 = vmatpush.bf16.msra.mxu2 %v713_v7  ;;  %2493 = vmatpush.bf16.msra.mxu3 %v713_v7  ;;  %v1054_v20 = vld [vmem:[%s3909_s2 + $0x50] sm:$0xff]  ;;  %v2484_v22 = vld [vmem:[%s3910_s1] sm:$0xff]  ;;  %v1057_v27 = vld [vmem:[%s3909_s2 + $0x68] sm:$0xff] }
   0x8   :  { %v2420_v23 = vld [vmem:[%s3911_s0] sm:$0xff]  ;;  %v1058_v26 = vld [vmem:[%s3909_s2 + $0x70] sm:$0xff]  ;;  %v1061_v30 = vld [vmem:[%s3909_s2 + $0x88] sm:$0xff] }
   0x9   :  { %v2436_v24 = vld [vmem:[%s3911_s0 + $0x80] sm:$0xff]  ;;  %v1059_v32 = vld [vmem:[%s3909_s2 + $0x78] sm:$0xff]  ;;  %v2421_v33 = vld [vmem:[%s3911_s0 + $0x8] sm:$0xff] }
   0xa   :  { %717 = vmatpush.bf16.msra.mxu0 %v2489_v8  ;;  %2494 = vmatpush.bf16.msra.mxu1 %v2489_v8  ;;  %v2452_v25 = vld [vmem:[%s3911_s0 + $0x100] sm:$0xff]  ;;  %v2437_v34 = vld [vmem:[%s3911_s0 + $0x88] sm:$0xff]  ;;  %v1063_v37 = vld [vmem:[%s3909_s2 + $0x98] sm:$0xff] }
   0xb   :  { %2495 = vmatpush.bf16.msra.mxu2 %v2489_v8  ;;  %1199 = vperm.xlu2 %2515, %v1049_v9   ;;  %v1056_v28 = vld [vmem:[%s3909_s2 + $0x60] sm:$0xff]  ;;  %v2453_v35 = vld [vmem:[%s3911_s0 + $0x108] sm:$0xff]  ;;  %v1062_v38 = vld [vmem:[%s3909_s2 + $0x90] sm:$0xff] }
   0xc   :  { %1189 = vperm.xlu1 %2514, %v1047_v10   ;;  %1179 = vperm.xlu0 %2513, %v1045_v11   ;;  %v2468_v29 = vld [vmem:[%s3911_s0 + $0x180] sm:$0xff]  ;;  %v2469_v39 = vld [vmem:[%s3911_s0 + $0x188] sm:$0xff]  ;;  %v1067_v40 = vld [vmem:[%s3909_s2 + $0xb8] sm:$0xff] }
   0xd   :  { %2496 = vmatpush.bf16.msra.mxu3 %v2489_v8  ;;  %v1060_v31 = vld [vmem:[%s3909_s2 + $0x80] sm:$0xff]  ;;  %v1066_v41 = vld [vmem:[%s3909_s2 + $0xb0] sm:$0xff]  ;;  %v1065_v42 = vld [vmem:[%s3909_s2 + $0xa8] sm:$0xff] }
   0xe   :  { %718 = vmatpush.bf16.msra.mxu0 %v2488_v12  ;;  %2497 = vmatpush.bf16.msra.mxu1 %v2488_v12  ;;  %v1064_v36 = vld [vmem:[%s3909_s2 + $0xa0] sm:$0xff]  ;;  %v2422_v43 = vld [vmem:[%s3911_s0 + $0x10] sm:$0xff]  ;;  %v1069_v47 = vld [vmem:[%s3909_s2 + $0xc8] sm:$0xff] }
   0xf   :  { %2498 = vmatpush.bf16.msra.mxu2 %v2488_v12  ;;  %v2438_v44 = vld [vmem:[%s3911_s0 + $0x90] sm:$0xff]  ;;  %v1068_v48 = vld [vmem:[%s3909_s2 + $0xc0] sm:$0xff]  ;;  %v1073_v50 = vld [vmem:[%s3909_s2 + $0xe8] sm:$0xff] }
  0x10   :  { %v2454_v45 = vld [vmem:[%s3911_s0 + $0x110] sm:$0xff]  ;;  %v1072_v51 = vld [vmem:[%s3909_s2 + $0xe0] sm:$0xff]  ;;  %v1071_v52 = vld [vmem:[%s3909_s2 + $0xd8] sm:$0xff] }
  0x11   :  { %2499 = vmatpush.bf16.msra.mxu3 %v2488_v12  ;;  %v1070_v46 = vld [vmem:[%s3909_s2 + $0xd0] sm:$0xff]  ;;  %v2423_v53 = vld [vmem:[%s3911_s0 + $0x18] sm:$0xff]  ;;  %v1076_v56 = vld [vmem:[%s3909_s2 + $0x100] sm:$0xff] }
  0x12   :  { %719 = vmatpush.bf16.msra.mxu0 %v2487_v13  ;;  %2500 = vmatpush.bf16.msra.mxu1 %v2487_v13  ;;  %v2470_v49 = vld [vmem:[%s3911_s0 + $0x190] sm:$0xff]  ;;  %v2439_v54 = vld [vmem:[%s3911_s0 + $0x98] sm:$0xff]  ;;  %v1077_v62 = vld [vmem:[%s3909_s2 + $0x108] sm:$0xff] }
  0x13   :  { %2501 = vmatpush.bf16.msra.mxu2 %v2487_v13  ;;  %1214 = vperm.xlu2 %2515, %v1052_v14   ;;  %v2455_v55 = vld [vmem:[%s3911_s0 + $0x118] sm:$0xff]  ;;  %v1074_v58 = vld [vmem:[%s3909_s2 + $0xf0] sm:$0xff]  ;;  %v2424_v0 = vld [vmem:[%s3911_s0 + $0x20] sm:$0xff] }
  0x14   :  { %1209 = vperm.xlu1 %2514, %v1051_v15   ;;  %1204 = vperm.xlu0 %2513, %v1050_v16   ;;  %v1075_v57 = vld [vmem:[%s3909_s2 + $0xf8] sm:$0xff]  ;;  %v1078_v61 = vld [vmem:[%s3909_s2 + $0x110] sm:$0xff]  ;;  %v2440_v1 = vld [vmem:[%s3911_s0 + $0xa0] sm:$0xff] }
  0x15   :  { %2502 = vmatpush.bf16.msra.mxu3 %v2487_v13  ;;  %v2471_v59 = vld [vmem:[%s3911_s0 + $0x198] sm:$0xff]  ;;  %v2456_v2 = vld [vmem:[%s3911_s0 + $0x120] sm:$0xff]  ;;  %v1082_v3 = vld [vmem:[%s3909_s2 + $0x130] sm:$0xff] }
  0x16   :  { %720 = vmatpush.bf16.msra.mxu0 %v2486_v17  ;;  %2503 = vmatpush.bf16.msra.mxu1 %v2486_v17  ;;  %v1079_v60 = vld [vmem:[%s3909_s2 + $0x118] sm:$0xff]  ;;  %v1081_v4 = vld [vmem:[%s3909_s2 + $0x128] sm:$0xff]  ;;  %v1080_v5 = vld [vmem:[%s3909_s2 + $0x120] sm:$0xff] }
  0x17   :  { %2504 = vmatpush.bf16.msra.mxu2 %v2486_v17  ;;  %v2472_v6 = vld [vmem:[%s3911_s0 + $0x1a0] sm:$0xff]  ;;  %v1085_v8 = vld [vmem:[%s3909_s2 + $0x148] sm:$0xff]  ;;  %v1083_v10 = vld [vmem:[%s3909_s2 + $0x138] sm:$0xff] }
  0x18   :  { %v1084_v9 = vld [vmem:[%s3909_s2 + $0x140] sm:$0xff]  ;;  %v2425_v12 = vld [vmem:[%s3911_s0 + $0x28] sm:$0xff]  ;;  %v1087_v16 = vld [vmem:[%s3909_s2 + $0x158] sm:$0xff] }
  0x19   :  { %2505 = vmatpush.bf16.msra.mxu3 %v2486_v17  ;;  %v2441_v13 = vld [vmem:[%s3911_s0 + $0xa8] sm:$0xff]  ;;  %v1088_v15 = vld [vmem:[%s3909_s2 + $0x160] sm:$0xff]  ;;  %v1086_v17 = vld [vmem:[%s3909_s2 + $0x150] sm:$0xff] }
  0x1a   :  { %721 = vmatpush.bf16.msra.mxu0 %v2485_v18  ;;  %2506 = vmatpush.bf16.msra.mxu1 %v2485_v18  ;;  %v2457_v14 = vld [vmem:[%s3911_s0 + $0x128] sm:$0xff] }
  0x1b   :  { %2507 = vmatpush.bf16.msra.mxu2 %v2485_v18  ;;  %1229 = vperm.xlu2 %2515, %v1055_v19  }
  0x1c   :  { %1224 = vperm.xlu1 %2514, %v1054_v20   ;;  %1219 = vperm.xlu0 %2513, %v1053_v21  }
  0x1d   :  { %2508 = vmatpush.bf16.msra.mxu3 %v2485_v18  ;;  %v2473_v18 = vld [vmem:[%s3911_s0 + $0x1a8] sm:$0xff] }
  0x1e   :  { %722 = vmatpush.bf16.msra.mxu0 %v2484_v22  ;;  %2509 = vmatpush.bf16.msra.mxu1 %v2484_v22 }
  0x1f   :  { %2510 = vmatpush.bf16.msra.mxu2 %v2484_v22 }
  0x21   :  { %2356 = vmatmul.msk.bf16.vlgmr.msra.gmra.mxu0 %vm518_vm1, %v2420_v23  ;;  %2372 = vmatmul.msk.bf16.vlgmr.msra.gmra.mxu1 %vm518_vm1, %v2436_v24  ;;  %v1090_v23 = vld [vmem:[%s3909_s2 + $0x170] sm:$0xff]  ;;  %v1089_v24 = vld [vmem:[%s3909_s2 + $0x168] sm:$0xff] }
  0x22   :  { %2388 = vmatmul.msk.bf16.vlgmr.msra.gmra.mxu2 %vm518_vm1, %v2452_v25  ;;  %2511 = vmatpush.bf16.msra.mxu3 %v2484_v22  ;;  %v1091_v22 = vld [vmem:[%s3909_s2 + $0x178] sm:$0xff] }
  0x23   :  { %1244 = vperm.xlu2 %2515, %v1058_v26   ;;  %v2426_v26 = vld [vmem:[%s3911_s0 + $0x30] sm:$0xff] }
  0x24   :  { %1239 = vperm.xlu1 %2514, %v1057_v27   ;;  %1234 = vperm.xlu0 %2513, %v1056_v28   ;;  %v2442_v27 = vld [vmem:[%s3911_s0 + $0xb0] sm:$0xff] }
  0x25   :  { %2404 = vmatmul.msk.bf16.vlgmr.msra.gmra.mxu3 %vm518_vm1, %v2468_v29 }
  0x2b   :  { %1259 = vperm.xlu2 %2515, %v1061_v30   ;;  %v2458_v30 = vld [vmem:[%s3911_s0 + $0x130] sm:$0xff] }
  0x2c   :  { %1254 = vperm.xlu1 %2514, %v1060_v31   ;;  %1249 = vperm.xlu0 %2513, %v1059_v32   ;;  %v1094_v31 = vld [vmem:[%s3909_s2 + $0x190] sm:$0xff]  ;;  %v1093_v32 = vld [vmem:[%s3909_s2 + $0x188] sm:$0xff] }
  0x31   :  { %2357 = vmatmul.msk.bf16.gmra.mxu0 %vm518_vm1, %v2421_v33  ;;  %2373 = vmatmul.msk.bf16.gmra.mxu1 %vm518_vm1, %v2437_v34  ;;  %v1092_v33 = vld [vmem:[%s3909_s2 + $0x180] sm:$0xff]  ;;  %v2474_v34 = vld [vmem:[%s3911_s0 + $0x1b0] sm:$0xff] }
  0x32   :  { %2389 = vmatmul.msk.bf16.gmra.mxu2 %vm518_vm1, %v2453_v35 }
  0x33   :  { %1274 = vperm.xlu2 %2515, %v1064_v36  }
  0x34   :  { %1269 = vperm.xlu1 %2514, %v1063_v37   ;;  %1264 = vperm.xlu0 %2513, %v1062_v38   ;;  %v1097_v38 = vld [vmem:[%s3909_s2 + $0x1a8] sm:$0xff] }
  0x35   :  { %2405 = vmatmul.msk.bf16.gmra.mxu3 %vm518_vm1, %v2469_v39  ;;  %v1096_v39 = vld [vmem:[%s3909_s2 + $0x1a0] sm:$0xff] }
  0x3b   :  { %1289 = vperm.xlu2 %2515, %v1067_v40   ;;  %v1095_v40 = vld [vmem:[%s3909_s2 + $0x198] sm:$0xff] }
  0x3c   :  { %1284 = vperm.xlu1 %2514, %v1066_v41   ;;  %1279 = vperm.xlu0 %2513, %v1065_v42   ;;  %v2427_v42 = vld [vmem:[%s3911_s0 + $0x38] sm:$0xff] }
  0x41   :  { %2358 = vmatmul.msk.bf16.gmra.mxu0 %vm518_vm1, %v2422_v43  ;;  %2374 = vmatmul.msk.bf16.gmra.mxu1 %vm518_vm1, %v2438_v44  ;;  %v2443_v43 = vld [vmem:[%s3911_s0 + $0xb8] sm:$0xff] }
  0x42   :  { %2390 = vmatmul.msk.bf16.gmra.mxu2 %vm518_vm1, %v2454_v45 }
  0x43   :  { %1304 = vperm.xlu2 %2515, %v1070_v46   ;;  %v2459_v46 = vld [vmem:[%s3911_s0 + $0x138] sm:$0xff] }
  0x44   :  { %1299 = vperm.xlu1 %2514, %v1069_v47   ;;  %1294 = vperm.xlu0 %2513, %v1068_v48   ;;  %v1100_v47 = vld [vmem:[%s3909_s2 + $0x1c0] sm:$0xff]  ;;  %v1099_v48 = vld [vmem:[%s3909_s2 + $0x1b8] sm:$0xff] }
  0x45   :  { %2406 = vmatmul.msk.bf16.gmra.mxu3 %vm518_vm1, %v2470_v49  ;;  %v1098_v49 = vld [vmem:[%s3909_s2 + $0x1b0] sm:$0xff] }
  0x4b   :  { %1319 = vperm.xlu2 %2515, %v1073_v50   ;;  %v2475_v50 = vld [vmem:[%s3911_s0 + $0x1b8] sm:$0xff] }
  0x4c   :  { %1314 = vperm.xlu1 %2514, %v1072_v51   ;;  %1309 = vperm.xlu0 %2513, %v1071_v52  }
  0x51   :  { %2359 = vmatmul.msk.bf16.gmra.mxu0 %vm518_vm1, %v2423_v53  ;;  %2375 = vmatmul.msk.bf16.gmra.mxu1 %vm518_vm1, %v2439_v54  ;;  %v1103_v54 = vld [vmem:[%s3909_s2 + $0x1d8] sm:$0xff] }
  0x52   :  { %2391 = vmatmul.msk.bf16.gmra.mxu2 %vm518_vm1, %v2455_v55  ;;  %v1102_v55 = vld [vmem:[%s3909_s2 + $0x1d0] sm:$0xff] }
  0x53   :  { %1334 = vperm.xlu2 %2515, %v1076_v56   ;;  %v1101_v56 = vld [vmem:[%s3909_s2 + $0x1c8] sm:$0xff] }
  0x54   :  { %1329 = vperm.xlu1 %2514, %v1075_v57   ;;  %1324 = vperm.xlu0 %2513, %v1074_v58   ;;  %v2428_v58 = vld [vmem:[%s3911_s0 + $0x40] sm:$0xff] }
  0x55   :  { %2407 = vmatmul.msk.bf16.gmra.mxu3 %vm518_vm1, %v2471_v59  ;;  %v2444_v59 = vld [vmem:[%s3911_s0 + $0xc0] sm:$0xff] }
  0x5b   :  { %1349 = vperm.xlu2 %2515, %v1079_v60  }
  0x5c   :  { %1344 = vperm.xlu1 %2514, %v1078_v61   ;;  %1339 = vperm.xlu0 %2513, %v1077_v62   ;;  %v2733_v63 = vpop.permute.xlu2 %1194  ;;  %v2460_v62 = vld [vmem:[%s3911_s0 + $0x140] sm:$0xff] }
  0x61   :  { %2360 = vmatmul.msk.bf16.gmra.mxu0 %vm518_vm1, %v2424_v0  ;;  %2376 = vmatmul.msk.bf16.gmra.mxu1 %vm518_vm1, %v2440_v1 }
  0x62   :  { %2392 = vmatmul.msk.bf16.gmra.mxu2 %vm518_vm1, %v2456_v2 }
  0x63   :  { %1364 = vperm.xlu2 %2515, %v1082_v3   ;;  %v1106_v3 = vld [vmem:[%s3909_s2 + $0x1f0] sm:$0xff] }
  0x64   :  { %1359 = vperm.xlu1 %2514, %v1081_v4   ;;  %1354 = vperm.xlu0 %2513, %v1080_v5   ;;  %v1105_v4 = vld [vmem:[%s3909_s2 + $0x1e8] sm:$0xff]  ;;  %v1104_v5 = vld [vmem:[%s3909_s2 + $0x1e0] sm:$0xff] }
  0x65   :  { %v2759_v7 = vpop.permute.xlu2 %1199  ;;  %2408 = vmatmul.msk.bf16.gmra.mxu3 %vm518_vm1, %v2472_v6  ;;  %v2476_v6 = vld [vmem:[%s3911_s0 + $0x1c0] sm:$0xff] }
  0x6b   :  { %1379 = vperm.xlu2 %2515, %v1085_v8  }
  0x6c   :  { %1374 = vperm.xlu1 %2514, %v1084_v9   ;;  %1369 = vperm.xlu0 %2513, %v1083_v10  }
  0x6d   :  { %v2771_v11 = vpop.permute.xlu2 %1214 }
  0x71   :  { %2361 = vmatmul.msk.bf16.gmra.mxu0 %vm518_vm1, %v2425_v12  ;;  %2377 = vmatmul.msk.bf16.gmra.mxu1 %vm518_vm1, %v2441_v13 }
  0x72   :  { %2393 = vmatmul.msk.bf16.gmra.mxu2 %vm518_vm1, %v2457_v14 }
  0x73   :  { %1394 = vperm.xlu2 %2515, %v1088_v15  }
  0x74   :  { %1389 = vperm.xlu1 %2514, %v1087_v16   ;;  %1384 = vperm.xlu0 %2513, %v1086_v17   ;;  %v1109_v16 = vld [vmem:[%s3909_s2 + $0x208] sm:$0xff] }
  0x75   :  { %v2797_v19 = vpop.permute.xlu2 %1229  ;;  %v2799_v20 = vpop.permute.xlu1 %1184  ;;  %2409 = vmatmul.msk.bf16.gmra.mxu3 %vm518_vm1, %v2473_v18  ;;  %v1108_v18 = vld [vmem:[%s3909_s2 + $0x200] sm:$0xff] }
  0x76   :  { %v2802_v21 = vpop.permute.xlu0 %1174 }
  0x7b   :  { %1409 = vperm.xlu2 %2515, %v1091_v22  }
  0x7c   :  { %1404 = vperm.xlu1 %2514, %v1090_v23   ;;  %1399 = vperm.xlu0 %2513, %v1089_v24   ;;  %v2429_v24 = vld [vmem:[%s3911_s0 + $0x48] sm:$0xff] }
  0x7d   :  { %v2813_v25 = vpop.permute.xlu2 %1244 }
  0x7e   :  { %v2821_v28 = vpop.permute.xlu1 %1189  ;;  %v2823_v29 = vpop.permute.xlu0 %1179 }
  0x81   :  { %2362 = vmatmul.msk.bf16.gmra.mxu0 %vm518_vm1, %v2426_v26  ;;  %2378 = vmatmul.msk.bf16.gmra.mxu1 %vm518_vm1, %v2442_v27  ;;  %v2445_v26 = vld [vmem:[%s3911_s0 + $0xc8] sm:$0xff] }
  0x82   :  { %2394 = vmatmul.msk.bf16.gmra.mxu2 %vm518_vm1, %v2458_v30 }
  0x83   :  { %1424 = vperm.xlu2 %2515, %v1094_v31   ;;  %v2461_v31 = vld [vmem:[%s3911_s0 + $0x148] sm:$0xff] }
  0x84   :  { %1419 = vperm.xlu1 %2514, %v1093_v32   ;;  %1414 = vperm.xlu0 %2513, %v1092_v33  }
  0x85   :  { %v2843_v35 = vpop.permute.xlu2 %1259  ;;  %2410 = vmatmul.msk.bf16.gmra.mxu3 %vm518_vm1, %v2474_v34 }
  0x86   :  { %v2846_v36 = vpop.permute.xlu1 %1209  ;;  %v2848_v37 = vpop.permute.xlu0 %1204 }
  0x8b   :  { %1439 = vperm.xlu2 %2515, %v1097_v38   ;;  %v1112_v38 = vld [vmem:[%s3909_s2 + $0x220] sm:$0xff] }
  0x8c   :  { %1434 = vperm.xlu1 %2514, %v1096_v39   ;;  %1429 = vperm.xlu0 %2513, %v1095_v40   ;;  %v1111_v40 = vld [vmem:[%s3909_s2 + $0x218] sm:$0xff] }
  0x8d   :  { %v2859_v41 = vpop.permute.xlu2 %1274 }
  0x8e   :  { %v2867_v44 = vpop.permute.xlu1 %1224  ;;  %v2869_v45 = vpop.permute.xlu0 %1219 }
  0x91   :  { %2363 = vmatmul.msk.bf16.gmra.mxu0 %vm518_vm1, %v2427_v42  ;;  %2379 = vmatmul.msk.bf16.gmra.mxu1 %vm518_vm1, %v2443_v43  ;;  %v1110_v42 = vld [vmem:[%s3909_s2 + $0x210] sm:$0xff] }
  0x92   :  { %2395 = vmatmul.msk.bf16.gmra.mxu2 %vm518_vm1, %v2459_v46 }
  0x93   :  { %1454 = vperm.xlu2 %2515, %v1100_v47  }
  0x94   :  { %1449 = vperm.xlu1 %2514, %v1099_v48   ;;  %1444 = vperm.xlu0 %2513, %v1098_v49  }
  0x95   :  { %v2889_v51 = vpop.permute.xlu2 %1289  ;;  %2411 = vmatmul.msk.bf16.gmra.mxu3 %vm518_vm1, %v2475_v50 }
  0x96   :  { %v2892_v52 = vpop.permute.xlu1 %1239  ;;  %v2894_v53 = vpop.permute.xlu0 %1234 }
  0x9b   :  { %1469 = vperm.xlu2 %2515, %v1103_v54  }
  0x9c   :  { %1464 = vperm.xlu1 %2514, %v1102_v55   ;;  %1459 = vperm.xlu0 %2513, %v1101_v56   ;;  %v1115_v56 = vld [vmem:[%s3909_s2 + $0x238] sm:$0xff] }
  0x9d   :  { %v2905_v57 = vpop.permute.xlu2 %1304 }
  0x9e   :  { %v2913_v60 = vpop.permute.xlu1 %1254  ;;  %v2915_v61 = vpop.permute.xlu0 %1249 }
  0x9f   :  { %v724_v0 = vpop.f32.mrf.mxu0  ;;  %v804_v1 = vpop.f32.mrf.mxu1 }
  0xa0   :  { %v1812_v2 = vmul.f32 %v2802_v21, %v724_v0  ;;  %v1107_v21 = vld [vmem:[%s3909_s2 + $0x1f8] sm:$0xff] }
  0xa1   :  { %2364 = vmatmul.msk.bf16.gmra.mxu0 %vm518_vm1, %v2428_v58  ;;  %2380 = vmatmul.msk.bf16.gmra.mxu1 %vm518_vm1, %v2444_v59  ;;  %v1114_v59 = vld [vmem:[%s3909_s2 + $0x230] sm:$0xff] }
  0xa2   :  { %1940 = vst [vmem:[%s3912_s3] sm:$0xff] %v1812_v2  ;;  %2396 = vmatmul.msk.bf16.gmra.mxu2 %vm518_vm1, %v2460_v62  ;;  %v1113_v62 = vld [vmem:[%s3909_s2 + $0x228] sm:$0xff]  ;;  %v2446_v2 = vld [vmem:[%s3911_s0 + $0xd0] sm:$0xff] }
  0xa3   :  { %1484 = vperm.xlu2 %2515, %v1106_v3  }
  0xa4   :  { %1479 = vperm.xlu1 %2514, %v1105_v4   ;;  %1474 = vperm.xlu0 %2513, %v1104_v5   ;;  %v2462_v5 = vld [vmem:[%s3911_s0 + $0x150] sm:$0xff] }
  0xa5   :  { %v2939_v8 = vpop.f32.mrf.mxu2  ;;  %v2941_v9 = vpop.permute.xlu2 %1319  ;;  %2412 = vmatmul.msk.bf16.gmra.mxu3 %vm518_vm1, %v2476_v6 }
  0xa6   :  { %v2944_v10 = vpop.permute.xlu1 %1269  ;;  %v2946_v12 = vpop.permute.xlu0 %1264 }
  0xa7   :  { %v726_v13 = vpop.f32.mrf.mxu0  ;;  %v2948_v14 = vpop.f32.mrf.mxu1 }
  0xa8   :  { %v1813_v15 = vmul.f32 %v2823_v29, %v726_v13  ;;  %v2954_v17 = vpop.f32.mrf.mxu3 }
  0xaa   :  { %1941 = vst [vmem:[%s3912_s3 + $0x8] sm:$0xff] %v1813_v15 }
  0xab   :  { %1499 = vperm.xlu2 %2515, %v1109_v16   ;;  %v1118_v16 = vld [vmem:[%s3909_s2 + $0x250] sm:$0xff] }
  0xac   :  { %1494 = vperm.xlu1 %2514, %v1108_v18   ;;  %1489 = vperm.xlu0 %2513, %v1107_v21   ;;  %v1117_v21 = vld [vmem:[%s3909_s2 + $0x248] sm:$0xff] }
  0xad   :  { %v2965_v22 = vpop.f32.mrf.mxu2  ;;  %v1335_v23 = vpop.permute.xlu2 %1334 }
  0xae   :  { %v1844_v27 = vmul.f32 %v1335_v23, %v804_v1  ;;  %v2973_v29 = vpop.permute.xlu1 %1284  ;;  %v2975_v30 = vpop.permute.xlu0 %1279  ;;  %v2430_v1 = vld [vmem:[%s3911_s0 + $0x50] sm:$0xff]  ;;  %v1116_v23 = vld [vmem:[%s3909_s2 + $0x240] sm:$0xff] }
  0xaf   :  { %v729_v32 = vpop.f32.mrf.mxu0  ;;  %v2980_v33 = vpop.f32.mrf.mxu1 }
  0xb0   :  { %1972 = vst [vmem:[%s3912_s3 + $0x100] sm:$0xff] %v1844_v27  ;;  %v1814_v34 = vmul.f32 %v2799_v20, %v729_v32  ;;  %v2989_v39 = vpop.f32.mrf.mxu3  ;;  %v2477_v20 = vld [vmem:[%s3911_s0 + $0x1c8] sm:$0xff] }
  0xb1   :  { %2365 = vmatmul.msk.bf16.gmra.mxu0 %vm518_vm1, %v2429_v24  ;;  %2381 = vmatmul.msk.bf16.gmra.mxu1 %vm518_vm1, %v2445_v26 }
  0xb2   :  { %1942 = vst [vmem:[%s3912_s3 + $0x10] sm:$0xff] %v1814_v34  ;;  %2397 = vmatmul.msk.bf16.gmra.mxu2 %vm518_vm1, %v2461_v31 }
  0xb3   :  { %1514 = vperm.xlu2 %2515, %v1112_v38  }
  0xb4   :  { %1509 = vperm.xlu1 %2514, %v1111_v40   ;;  %1504 = vperm.xlu0 %2513, %v1110_v42   ;;  %v1121_v40 = vld [vmem:[%s3909_s2 + $0x268] sm:$0xff] }
  0xb5   :  { %v3006_v43 = vpop.f32.mrf.mxu2  ;;  %v1350_v46 = vpop.permute.xlu2 %1349  ;;  %2413 = vmatmul.msk.bf16.gmra.mxu3 %vm518_vm1, %v2477_v20  ;;  %v1120_v20 = vld [vmem:[%s3909_s2 + $0x260] sm:$0xff] }
  0xb6   :  { %v3009_v47 = vpop.permute.xlu1 %1299  ;;  %v3011_v48 = vpop.permute.xlu0 %1294 }
  0xb7   :  { %v731_v49 = vpop.f32.mrf.mxu0  ;;  %v811_v50 = vpop.f32.mrf.mxu1 }
  0xb8   :  { %v1815_v54 = vmul.f32 %v2821_v28, %v731_v49  ;;  %v1847_v55 = vmul.f32 %v1350_v46, %v811_v50  ;;  %v3017_v58 = vpop.f32.mrf.mxu3  ;;  %v1119_v46 = vld [vmem:[%s3909_s2 + $0x258] sm:$0xff] }
  0xb9   :  { %v2431_v50 = vld [vmem:[%s3911_s0 + $0x58] sm:$0xff] }
  0xba   :  { %1943 = vst [vmem:[%s3912_s3 + $0x18] sm:$0xff] %v1815_v54  ;;  %v2447_v54 = vld [vmem:[%s3911_s0 + $0xd8] sm:$0xff] }
  0xbb   :  { %1975 = vst [vmem:[%s3912_s3 + $0x118] sm:$0xff] %v1847_v55  ;;  %1529 = vperm.xlu2 %2515, %v1115_v56  }
  0xbc   :  { %1524 = vperm.xlu1 %2514, %v1114_v59   ;;  %1519 = vperm.xlu0 %2513, %v1113_v62   ;;  %v2463_v59 = vld [vmem:[%s3911_s0 + $0x158] sm:$0xff] }
  0xbd   :  { %v3031_v28 = vpop.f32.mrf.mxu2  ;;  %v1365_v0 = vpop.permute.xlu2 %1364 }
  0xbe   :  { %v3039_v3 = vpop.permute.xlu1 %1314  ;;  %v3041_v4 = vpop.permute.xlu0 %1309 }
  0xbf   :  { %v734_v6 = vpop.f32.mrf.mxu0  ;;  %v3046_v13 = vpop.f32.mrf.mxu1 }
  0xc0   :  { %v1816_v15 = vmul.f32 %v2733_v63, %v734_v6  ;;  %v3052_v18 = vpop.f32.mrf.mxu3  ;;  %v2478_v63 = vld [vmem:[%s3911_s0 + $0x1d0] sm:$0xff] }
  0xc1   :  { %2366 = vmatmul.msk.bf16.gmra.mxu0 %vm518_vm1, %v2430_v1  ;;  %2382 = vmatmul.msk.bf16.gmra.mxu1 %vm518_vm1, %v2446_v2 }
  0xc2   :  { %1944 = vst [vmem:[%s3912_s3 + $0x20] sm:$0xff] %v1816_v15  ;;  %2398 = vmatmul.msk.bf16.gmra.mxu2 %vm518_vm1, %v2462_v5 }
  0xc3   :  { %1544 = vperm.xlu2 %2515, %v1118_v16   ;;  %v1124_v16 = vld [vmem:[%s3909_s2 + $0x280] sm:$0xff] }
  0xc4   :  { %1539 = vperm.xlu1 %2514, %v1117_v21   ;;  %1534 = vperm.xlu0 %2513, %v1116_v23  }
  0xc5   :  { %v3069_v24 = vpop.f32.mrf.mxu2  ;;  %v3071_v26 = vpop.permute.xlu2 %1379  ;;  %2414 = vmatmul.msk.bf16.gmra.mxu3 %vm518_vm1, %v2478_v63 }
  0xc6   :  { %v3074_v27 = vpop.permute.xlu1 %1329  ;;  %v3076_v31 = vpop.permute.xlu0 %1324 }
  0xc7   :  { %3913 = vst [vmem:[#allocation2_spill] sm:$0xff] %v3074_v27  ;;  %v736_v32 = vpop.f32.mrf.mxu0  ;;  %v816_v34 = vpop.f32.mrf.mxu1 }
  0xc8   :  { %3914 = vst [vmem:[#allocation3_spill] sm:$0xff] %v3076_v31  ;;  %v1817_v38 = vmul.f32 %v2759_v7, %v736_v32  ;;  %v3082_v42 = vpop.f32.mrf.mxu3 }
  0xca   :  { %1945 = vst [vmem:[%s3912_s3 + $0x28] sm:$0xff] %v1817_v38 }
  0xcb   :  { %1559 = vperm.xlu2 %2515, %v1121_v40  }
  0xcc   :  { %1554 = vperm.xlu1 %2514, %v1120_v20   ;;  %1549 = vperm.xlu0 %2513, %v1119_v46  }
  0xcd   :  { %v3093_v7 = vpop.f32.mrf.mxu2  ;;  %v3095_v49 = vpop.permute.xlu2 %1394 }
  0xce   :  { %v1345_v55 = vpop.permute.xlu1 %1344  ;;  %v1340_v56 = vpop.permute.xlu0 %1339 }
  0xcf   :  { %v1846_v62 = vmul.f32 %v1345_v55, %v2980_v33  ;;  %v1845_v1 = vmul.f32 %v1340_v56, %v2948_v14  ;;  %v739_v2 = vpop.f32.mrf.mxu0  ;;  %v819_v5 = vpop.f32.mrf.mxu1  ;;  %v1123_v14 = vld [vmem:[%s3909_s2 + $0x278] sm:$0xff] }
  0xd0   :  { %v1818_v6 = vmul.f32 %v2848_v37, %v739_v2  ;;  %v1850_v15 = vmul.f32 %v1365_v0, %v819_v5  ;;  %v3112_v21 = vpop.f32.mrf.mxu3  ;;  %v1122_v37 = vld [vmem:[%s3909_s2 + $0x270] sm:$0xff]  ;;  %v2479_v33 = vld [vmem:[%s3911_s0 + $0x1d8] sm:$0xff]  ;;  %v2464_v5 = vld [vmem:[%s3911_s0 + $0x160] sm:$0xff] }
  0xd1   :  { %1974 = vst [vmem:[%s3912_s3 + $0x110] sm:$0xff] %v1846_v62  ;;  %2367 = vmatmul.msk.bf16.gmra.mxu0 %vm518_vm1, %v2431_v50  ;;  %2383 = vmatmul.msk.bf16.gmra.mxu1 %vm518_vm1, %v2447_v54  ;;  %v1127_v54 = vld [vmem:[%s3909_s2 + $0x298] sm:$0xff]  ;;  %v2448_v62 = vld [vmem:[%s3911_s0 + $0xe0] sm:$0xff] }
  0xd2   :  { %1973 = vst [vmem:[%s3912_s3 + $0x108] sm:$0xff] %v1845_v1  ;;  %2399 = vmatmul.msk.bf16.gmra.mxu2 %vm518_vm1, %v2463_v59  ;;  %v2432_v59 = vld [vmem:[%s3911_s0 + $0x60] sm:$0xff] }
  0xd3   :  { %1946 = vst [vmem:[%s3912_s3 + $0x30] sm:$0xff] %v1818_v6  ;;  %1574 = vperm.xlu2 %2515, %v1124_v16  }
  0xd4   :  { %1978 = vst [vmem:[%s3912_s3 + $0x130] sm:$0xff] %v1850_v15  ;;  %1569 = vperm.xlu1 %2514, %v1123_v14   ;;  %1564 = vperm.xlu0 %2513, %v1122_v37  }
  0xd5   :  { %v3138_v0 = vpop.f32.mrf.mxu2  ;;  %v3140_v23 = vpop.permute.xlu2 %1409  ;;  %2415 = vmatmul.msk.bf16.gmra.mxu3 %vm518_vm1, %v2479_v33  ;;  %v1130_v33 = vld [vmem:[%s3909_s2 + $0x2b0] sm:$0xff] }
  0xd6   :  { %v1360_v63 = vpop.permute.xlu1 %1359  ;;  %v1355_v32 = vpop.permute.xlu0 %1354 }
  0xd7   :  { %v1849_v38 = vmul.f32 %v1360_v63, %v816_v34  ;;  %v1848_v40 = vmul.f32 %v1355_v32, %v3046_v13  ;;  %v741_v20 = vpop.f32.mrf.mxu0  ;;  %v821_v46 = vpop.f32.mrf.mxu1  ;;  %v1126_v34 = vld [vmem:[%s3909_s2 + $0x290] sm:$0xff]  ;;  %v1125_v13 = vld [vmem:[%s3909_s2 + $0x288] sm:$0xff] }
  0xd8   :  { %v1819_v50 = vmul.f32 %v2846_v36, %v741_v20  ;;  %v3148_v55 = vpop.f32.mrf.mxu3  ;;  %v1129_v32 = vld [vmem:[%s3909_s2 + $0x2a8] sm:$0xff] }
  0xd9   :  { %1977 = vst [vmem:[%s3912_s3 + $0x128] sm:$0xff] %v1849_v38  ;;  %v2480_v38 = vld [vmem:[%s3911_s0 + $0x1e0] sm:$0xff] }
  0xda   :  { %1976 = vst [vmem:[%s3912_s3 + $0x120] sm:$0xff] %v1848_v40 }
  0xdb   :  { %1947 = vst [vmem:[%s3912_s3 + $0x38] sm:$0xff] %v1819_v50  ;;  %1589 = vperm.xlu2 %2515, %v1127_v54  }
  0xdc   :  { %1584 = vperm.xlu1 %2514, %v1126_v34   ;;  %1579 = vperm.xlu0 %2513, %v1125_v13  }
  0xdd   :  { %v3165_v36 = vpop.f32.mrf.mxu2  ;;  %v3167_v56 = vpop.permute.xlu2 %1424 }
  0xde   :  { %v1375_v1 = vpop.permute.xlu1 %1374  ;;  %v1370_v2 = vpop.permute.xlu0 %1369 }
  0xdf   :  { %v1851_v6 = vmul.f32 %v1370_v2, %v821_v46  ;;  %v744_v15 = vpop.f32.mrf.mxu0  ;;  %v824_v16 = vpop.f32.mrf.mxu1  ;;  %v1132_v2 = vld [vmem:[%s3909_s2 + $0x2c0] sm:$0xff] }
  0xe0   :  { %v1820_v14 = vmul.f32 %v2771_v11, %v744_v15  ;;  %v1852_v37 = vmul.f32 %v1375_v1, %v824_v16  ;;  %v3182_v63 = vpop.f32.mrf.mxu3  ;;  %v1128_v11 = vld [vmem:[%s3909_s2 + $0x2a0] sm:$0xff]  ;;  %v2449_v15 = vld [vmem:[%s3911_s0 + $0xe8] sm:$0xff] }
  0xe1   :  { %1979 = vst [vmem:[%s3912_s3 + $0x138] sm:$0xff] %v1851_v6  ;;  %2368 = vmatmul.msk.bf16.gmra.mxu0 %vm518_vm1, %v2432_v59  ;;  %2384 = vmatmul.msk.bf16.gmra.mxu1 %vm518_vm1, %v2448_v62  ;;  %v1133_v62 = vld [vmem:[%s3909_s2 + $0x2c8] sm:$0xff] }
  0xe2   :  { %1948 = vst [vmem:[%s3912_s3 + $0x40] sm:$0xff] %v1820_v14  ;;  %2400 = vmatmul.msk.bf16.gmra.mxu2 %vm518_vm1, %v2464_v5  ;;  %v1131_v5 = vld [vmem:[%s3909_s2 + $0x2b8] sm:$0xff]  ;;  %v2433_v6 = vld [vmem:[%s3911_s0 + $0x68] sm:$0xff] }
  0xe3   :  { %1980 = vst [vmem:[%s3912_s3 + $0x140] sm:$0xff] %v1852_v37  ;;  %1604 = vperm.xlu2 %2515, %v1130_v33   ;;  %v2465_v37 = vld [vmem:[%s3911_s0 + $0x168] sm:$0xff] }
  0xe4   :  { %1599 = vperm.xlu1 %2514, %v1129_v32   ;;  %1594 = vperm.xlu0 %2513, %v1128_v11  }
  0xe5   :  { %v3205_v40 = vpop.f32.mrf.mxu2  ;;  %v3207_v20 = vpop.permute.xlu2 %1439  ;;  %2416 = vmatmul.msk.bf16.gmra.mxu3 %vm518_vm1, %v2480_v38 }
  0xe6   :  { %v1390_v46 = vpop.permute.xlu1 %1389  ;;  %v1385_v50 = vpop.permute.xlu0 %1384 }
  0xe7   :  { %v746_v54 = vpop.f32.mrf.mxu0  ;;  %v826_v34 = vpop.f32.mrf.mxu1 }
  0xe8   :  { %v1821_v13 = vmul.f32 %v2869_v45, %v746_v54  ;;  %v1853_v59 = vmul.f32 %v3071_v26, %v826_v34  ;;  %v3215_v1 = vpop.f32.mrf.mxu3  ;;  %v1136_v54 = vld [vmem:[%s3909_s2 + $0x2e0] sm:$0xff] }
  0xea   :  { %1949 = vst [vmem:[%s3912_s3 + $0x48] sm:$0xff] %v1821_v13  ;;  %v1135_v13 = vld [vmem:[%s3909_s2 + $0x2d8] sm:$0xff] }
  0xeb   :  { %1981 = vst [vmem:[%s3912_s3 + $0x148] sm:$0xff] %v1853_v59  ;;  %1619 = vperm.xlu2 %2515, %v1133_v62   ;;  %v1134_v59 = vld [vmem:[%s3909_s2 + $0x2d0] sm:$0xff] }
  0xec   :  { %1614 = vperm.xlu1 %2514, %v1132_v2   ;;  %1609 = vperm.xlu0 %2513, %v1131_v5  }
  0xed   :  { %v3229_v45 = vpop.f32.mrf.mxu2  ;;  %v3231_v26 = vpop.permute.xlu2 %1454 }
  0xee   :  { %v3239_v16 = vpop.permute.xlu1 %1404  ;;  %v3241_v14 = vpop.permute.xlu0 %1399 }
  0xef   :  { %v749_v33 = vpop.f32.mrf.mxu0  ;;  %v829_v32 = vpop.f32.mrf.mxu1 }
  0xf0   :  { %v1822_v11 = vmul.f32 %v2867_v44, %v749_v33  ;;  %v1854_v38 = vmul.f32 %v1385_v50, %v829_v32  ;;  %v3250_v34 = vpop.f32.mrf.mxu3  ;;  %v2481_v44 = vld [vmem:[%s3911_s0 + $0x1e8] sm:$0xff]  ;;  %v1139_v32 = vld [vmem:[%s3909_s2 + $0x2f8] sm:$0xff] }
  0xf1   :  { %3915 = vst [vmem:[#allocation4_spill] sm:$0xff] %v3250_v34  ;;  %2369 = vmatmul.msk.bf16.gmra.mxu0 %vm518_vm1, %v2433_v6  ;;  %2385 = vmatmul.msk.bf16.gmra.mxu1 %vm518_vm1, %v2449_v15  ;;  %v1147_v34 = vld [vmem:[%s3909_s2 + $0x338] sm:$0xff] }
  0xf2   :  { %1950 = vst [vmem:[%s3912_s3 + $0x50] sm:$0xff] %v1822_v11  ;;  %2401 = vmatmul.msk.bf16.gmra.mxu2 %vm518_vm1, %v2465_v37 }
  0xf3   :  { %1982 = vst [vmem:[%s3912_s3 + $0x150] sm:$0xff] %v1854_v38  ;;  %1634 = vperm.xlu2 %2515, %v1136_v54   ;;  %v1138_v38 = vld [vmem:[%s3909_s2 + $0x2f0] sm:$0xff]  ;;  %v1137_v54 = vld [vmem:[%s3909_s2 + $0x2e8] sm:$0xff] }
  0xf4   :  { %1629 = vperm.xlu1 %2514, %v1135_v13   ;;  %1624 = vperm.xlu0 %2513, %v1134_v59   ;;  %v2434_v13 = vld [vmem:[%s3911_s0 + $0x70] sm:$0xff] }
  0xf5   :  { %v3270_v50 = vpop.f32.mrf.mxu2  ;;  %v3272_v62 = vpop.permute.xlu2 %1469  ;;  %2417 = vmatmul.msk.bf16.gmra.mxu3 %vm518_vm1, %v2481_v44  ;;  %v2450_v59 = vld [vmem:[%s3911_s0 + $0xf0] sm:$0xff] }
  0xf6   :  { %v3275_v2 = vpop.permute.xlu1 %1419  ;;  %v3277_v5 = vpop.permute.xlu0 %1414 }
  0xf7   :  { %v751_v6 = vpop.f32.mrf.mxu0  ;;  %v831_v15 = vpop.f32.mrf.mxu1 }
  0xf8   :  { %v1823_v37 = vmul.f32 %v2797_v19, %v751_v6  ;;  %v1855_v33 = vmul.f32 %v1390_v46, %v831_v15  ;;  %v3283_v11 = vpop.f32.mrf.mxu3  ;;  %v2466_v15 = vld [vmem:[%s3911_s0 + $0x170] sm:$0xff] }
  0xf9   :  { %3916 = vst [vmem:[#allocation5_spill] sm:$0xff] %v3283_v11 }
  0xfa   :  { %1951 = vst [vmem:[%s3912_s3 + $0x58] sm:$0xff] %v1823_v37 }
  0xfb   :  { %1983 = vst [vmem:[%s3912_s3 + $0x158] sm:$0xff] %v1855_v33  ;;  %1649 = vperm.xlu2 %2515, %v1139_v32  }
  0xfc   :  { %1644 = vperm.xlu1 %2514, %v1138_v38   ;;  %1639 = vperm.xlu0 %2513, %v1137_v54   ;;  %v1142_v54 = vld [vmem:[%s3909_s2 + $0x310] sm:$0xff] }
  0xfd   :  { %v3297_v19 = vpop.f32.mrf.mxu2  ;;  %v3299_v46 = vpop.permute.xlu2 %1484 }
  0xfe   :  { %3917 = vst [vmem:[#allocation6_spill] sm:$0xff] %v3299_v46  ;;  %v3307_v44 = vpop.permute.xlu1 %1434  ;;  %v3309_v6 = vpop.permute.xlu0 %1429  ;;  %v1141_v46 = vld [vmem:[%s3909_s2 + $0x308] sm:$0xff] }
  0xff   :  { %v754_v37 = vpop.f32.mrf.mxu0  ;;  %v834_v33 = vpop.f32.mrf.mxu1 }
 0x100   :  { %v1824_v32 = vmul.f32 %v2894_v53, %v754_v37  ;;  %v1856_v38 = vmul.f32 %v3095_v49, %v834_v33  ;;  %v3319_v27 = vpop.f32.mrf.mxu3  ;;  %v1140_v53 = vld [vmem:[%s3909_s2 + $0x300] sm:$0xff]  ;;  %v2482_v49 = vld [vmem:[%s3911_s0 + $0x1f0] sm:$0xff] }
 0x101   :  { %2370 = vmatmul.msk.bf16.gmra.mxu0 %vm518_vm1, %v2434_v13  ;;  %2386 = vmatmul.msk.bf16.gmra.mxu1 %vm518_vm1, %v2450_v59 }
 0x102   :  { %1952 = vst [vmem:[%s3912_s3 + $0x60] sm:$0xff] %v1824_v32  ;;  %2402 = vmatmul.msk.bf16.gmra.mxu2 %vm518_vm1, %v2466_v15 }
 0x103   :  { %1984 = vst [vmem:[%s3912_s3 + $0x160] sm:$0xff] %v1856_v38  ;;  %1664 = vperm.xlu2 %2515, %v1142_v54   ;;  %v1145_v54 = vld [vmem:[%s3909_s2 + $0x328] sm:$0xff] }
 0x104   :  { %1659 = vperm.xlu1 %2514, %v1141_v46   ;;  %1654 = vperm.xlu0 %2513, %v1140_v53  }
 0x105   :  { %v3339_v13 = vpop.f32.mrf.mxu2  ;;  %v1500_v59 = vpop.permute.xlu2 %1499  ;;  %2418 = vmatmul.msk.bf16.gmra.mxu3 %vm518_vm1, %v2482_v49  ;;  %v1143_v49 = vld [vmem:[%s3909_s2 + $0x318] sm:$0xff] }
 0x106   :  { %v1877_v37 = vmul.f32 %v1500_v59, %v2965_v22  ;;  %v3343_v33 = vpop.permute.xlu1 %1449  ;;  %v3345_v31 = vpop.permute.xlu0 %1444  ;;  %v1144_v22 = vld [vmem:[%s3909_s2 + $0x320] sm:$0xff]  ;;  %v2435_v59 = vld [vmem:[%s3911_s0 + $0x78] sm:$0xff] }
 0x107   :  { %v756_v32 = vpop.f32.mrf.mxu0  ;;  %v836_v15 = vpop.f32.mrf.mxu1 }
 0x108   :  { %2005 = vst [vmem:[%s3912_s3 + $0x208] sm:$0xff] %v1877_v37  ;;  %v1825_v46 = vmul.f32 %v2892_v52, %v756_v32  ;;  %v1857_v38 = vmul.f32 %v3241_v14, %v836_v15  ;;  %v3355_v53 = vpop.f32.mrf.mxu3  ;;  %v2451_v37 = vld [vmem:[%s3911_s0 + $0xf8] sm:$0xff] }
 0x109   :  { %3918 = vst [vmem:[#allocation7_spill] sm:$0xff] %v3355_v53 }
 0x10a   :  { %1953 = vst [vmem:[%s3912_s3 + $0x68] sm:$0xff] %v1825_v46 }
 0x10b   :  { %1985 = vst [vmem:[%s3912_s3 + $0x168] sm:$0xff] %v1857_v38  ;;  %1679 = vperm.xlu2 %2515, %v1145_v54   ;;  %v2467_v38 = vld [vmem:[%s3911_s0 + $0x178] sm:$0xff] }
 0x10c   :  { %1674 = vperm.xlu1 %2514, %v1144_v22   ;;  %1669 = vperm.xlu0 %2513, %v1143_v49  }
 0x10d   :  { %v3369_v52 = vpop.f32.mrf.mxu2  ;;  %v1515_v14 = vpop.permute.xlu2 %1514 }
 0x10e   :  { %v1880_v32 = vmul.f32 %v1515_v14, %v3069_v24  ;;  %v3378_v15 = vpop.permute.xlu1 %1464  ;;  %v3380_v46 = vpop.permute.xlu0 %1459  ;;  %v1148_v24 = vld [vmem:[%s3909_s2 + $0x340] sm:$0xff] }
 0x10f   :  { %v759_v54 = vpop.f32.mrf.mxu0  ;;  %v839_v22 = vpop.f32.mrf.mxu1 }
 0x110   :  { %2008 = vst [vmem:[%s3912_s3 + $0x220] sm:$0xff] %v1880_v32  ;;  %v1826_v49 = vmul.f32 %v2813_v25, %v759_v54  ;;  %v1858_v53 = vmul.f32 %v3239_v16, %v839_v22  ;;  %v3393_v14 = vpop.f32.mrf.mxu3  ;;  %v1146_v25 = vld [vmem:[%s3909_s2 + $0x330] sm:$0xff]  ;;  %v2483_v16 = vld [vmem:[%s3911_s0 + $0x1f8] sm:$0xff] }
 0x111   :  { %3919 = vst [vmem:[#allocation8_spill] sm:$0xff] %v3393_v14  ;;  %2371 = vmatmul.msk.bf16.gmra.mxu0 %vm518_vm1, %v2435_v59  ;;  %2387 = vmatmul.msk.bf16.gmra.mxu1 %vm518_vm1, %v2451_v37 }
 0x112   :  { %1954 = vst [vmem:[%s3912_s3 + $0x70] sm:$0xff] %v1826_v49  ;;  %2403 = vmatmul.msk.bf16.gmra.mxu2 %vm518_vm1, %v2467_v38 }
 0x113   :  { %1986 = vst [vmem:[%s3912_s3 + $0x170] sm:$0xff] %v1858_v53  ;;  %1694 = vperm.xlu2 %2515, %v1148_v24   ;;  %v1151_v24 = vld [vmem:[%s3909_s2 + $0x358] sm:$0xff] }
 0x114   :  { %1689 = vperm.xlu1 %2514, %v1147_v34   ;;  %1684 = vperm.xlu0 %2513, %v1146_v25  }
 0x115   :  { %v3413_v59 = vpop.f32.mrf.mxu2  ;;  %v1530_v37 = vpop.permute.xlu2 %1529  ;;  %2419 = vmatmul.msk.bf16.gmra.mxu3 %vm518_vm1, %v2483_v16  ;;  %v1149_v16 = vld [vmem:[%s3909_s2 + $0x348] sm:$0xff] }
 0x116   :  { %v1883_v32 = vmul.f32 %v1530_v37, %v3165_v36  ;;  %v3417_v54 = vpop.permute.xlu1 %1479  ;;  %v3419_v38 = vpop.permute.xlu0 %1474  ;;  %v1150_v36 = vld [vmem:[%s3909_s2 + $0x350] sm:$0xff] }
 0x117   :  { %v761_v22 = vpop.f32.mrf.mxu0  ;;  %v841_v53 = vpop.f32.mrf.mxu1 }
 0x118   :  { %2011 = vst [vmem:[%s3912_s3 + $0x238] sm:$0xff] %v1883_v32  ;;  %v1827_v34 = vmul.f32 %v2915_v61, %v761_v22  ;;  %v1859_v49 = vmul.f32 %v3140_v23, %v841_v53  ;;  %v3429_v25 = vpop.f32.mrf.mxu3 }
 0x11a   :  { %1955 = vst [vmem:[%s3912_s3 + $0x78] sm:$0xff] %v1827_v34 }
 0x11b   :  { %1987 = vst [vmem:[%s3912_s3 + $0x178] sm:$0xff] %v1859_v49  ;;  %1709 = vperm.xlu2 %2515, %v1151_v24   ;;  %v1154_v24 = vld [vmem:[%s3909_s2 + $0x370] sm:$0xff] }
 0x11c   :  { %1704 = vperm.xlu1 %2514, %v1150_v36   ;;  %1699 = vperm.xlu0 %2513, %v1149_v16  }
 0x11d   :  { %v3443_v61 = vpop.f32.mrf.mxu2  ;;  %v1545_v23 = vpop.permute.xlu2 %1544 }
 0x11e   :  { %v1886_v37 = vmul.f32 %v1545_v23, %v3270_v50  ;;  %v1495_v32 = vpop.permute.xlu1 %1494  ;;  %v3446_v22 = vpop.permute.xlu0 %1489 }
 0x11f   :  { %v1876_v53 = vmul.f32 %v1495_v32, %v2939_v8  ;;  %v764_v14 = vpop.f32.mrf.mxu0  ;;  %v844_v11 = vpop.f32.mrf.mxu1  ;;  %v1153_v8 = vld [vmem:[%s3909_s2 + $0x368] sm:$0xff] }
 0x120   :  { %2014 = vst [vmem:[%s3912_s3 + $0x250] sm:$0xff] %v1886_v37  ;;  %v1828_v34 = vmul.f32 %v2913_v60, %v764_v14  ;;  %v1860_v49 = vmul.f32 %v3277_v5, %v844_v11  ;;  %v3457_v50 = vpop.f32.mrf.mxu3  ;;  %v1152_v60 = vld [vmem:[%s3909_s2 + $0x360] sm:$0xff] }
 0x121   :  { %2004 = vst [vmem:[%s3912_s3 + $0x200] sm:$0xff] %v1876_v53 }
 0x122   :  { %1956 = vst [vmem:[%s3912_s3 + $0x80] sm:$0xff] %v1828_v34 }
 0x123   :  { %1988 = vst [vmem:[%s3912_s3 + $0x180] sm:$0xff] %v1860_v49  ;;  %1724 = vperm.xlu2 %2515, %v1154_v24  }
 0x124   :  { %1719 = vperm.xlu1 %2514, %v1153_v8   ;;  %1714 = vperm.xlu0 %2513, %v1152_v60  }
 0x125   :  { %v924_v5 = vpop.f32.mrf.mxu2  ;;  %v1560_v11 = vpop.permute.xlu2 %1559 }
 0x126   :  { %v1889_v14 = vmul.f32 %v1560_v11, %v3369_v52  ;;  %v1510_v36 = vpop.permute.xlu1 %1509  ;;  %v1505_v16 = vpop.permute.xlu0 %1504  ;;  %v1157_v52 = vld [vmem:[%s3909_s2 + $0x388] sm:$0xff] }
 0x127   :  { %v1879_v23 = vmul.f32 %v1510_v36, %v3031_v28  ;;  %v1878_v37 = vmul.f32 %v1505_v16, %v3006_v43  ;;  %v766_v32 = vpop.f32.mrf.mxu0  ;;  %v846_v53 = vpop.f32.mrf.mxu1  ;;  %v1156_v43 = vld [vmem:[%s3909_s2 + $0x380] sm:$0xff] }
 0x128   :  { %2017 = vst [vmem:[%s3912_s3 + $0x268] sm:$0xff] %v1889_v14  ;;  %v1829_v34 = vmul.f32 %v2843_v35, %v766_v32  ;;  %v1861_v49 = vmul.f32 %v3275_v2, %v846_v53  ;;  %v3485_v24 = vpop.f32.mrf.mxu3  ;;  %v1155_v35 = vld [vmem:[%s3909_s2 + $0x378] sm:$0xff] }
 0x129   :  { %2007 = vst [vmem:[%s3912_s3 + $0x218] sm:$0xff] %v1879_v23 }
 0x12a   :  { %2006 = vst [vmem:[%s3912_s3 + $0x210] sm:$0xff] %v1878_v37 }
 0x12b   :  { %1957 = vst [vmem:[%s3912_s3 + $0x88] sm:$0xff] %v1829_v34  ;;  %1739 = vperm.xlu2 %2515, %v1157_v52  }
 0x12c   :  { %1989 = vst [vmem:[%s3912_s3 + $0x188] sm:$0xff] %v1861_v49  ;;  %1734 = vperm.xlu1 %2514, %v1156_v43   ;;  %1729 = vperm.xlu0 %2513, %v1155_v35  }
 0x12d   :  { %v3505_v28 = vpop.f32.mrf.mxu2  ;;  %v1575_v2 = vpop.permute.xlu2 %1574 }
 0x12e   :  { %v1892_v8 = vmul.f32 %v1575_v2, %v924_v5  ;;  %v1525_v60 = vpop.permute.xlu1 %1524  ;;  %v1520_v11 = vpop.permute.xlu0 %1519  ;;  %v1160_v5 = vld [vmem:[%s3909_s2 + $0x3a0] sm:$0xff] }
 0x12f   :  { %v1882_v14 = vmul.f32 %v1525_v60, %v3138_v0  ;;  %v1881_v36 = vmul.f32 %v1520_v11, %v3093_v7  ;;  %v769_v16 = vpop.f32.mrf.mxu0  ;;  %v849_v23 = vpop.f32.mrf.mxu1  ;;  %v1159_v7 = vld [vmem:[%s3909_s2 + $0x398] sm:$0xff] }
 0x130   :  { %2020 = vst [vmem:[%s3912_s3 + $0x280] sm:$0xff] %v1892_v8  ;;  %v1830_v37 = vmul.f32 %v2946_v12, %v769_v16  ;;  %v1862_v32 = vmul.f32 %v3167_v56, %v849_v23  ;;  %v3517_v53 = vpop.f32.mrf.mxu3  ;;  %v1158_v12 = vld [vmem:[%s3909_s2 + $0x390] sm:$0xff]  ;;  %v1163_v11 = vld [vmem:[%s3909_s2 + $0x3b8] sm:$0xff] }
 0x131   :  { %2010 = vst [vmem:[%s3912_s3 + $0x230] sm:$0xff] %v1882_v14 }
 0x132   :  { %2009 = vst [vmem:[%s3912_s3 + $0x228] sm:$0xff] %v1881_v36 }
 0x133   :  { %1958 = vst [vmem:[%s3912_s3 + $0x90] sm:$0xff] %v1830_v37  ;;  %1754 = vperm.xlu2 %2515, %v1160_v5  }
 0x134   :  { %1990 = vst [vmem:[%s3912_s3 + $0x190] sm:$0xff] %v1862_v32  ;;  %1749 = vperm.xlu1 %2514, %v1159_v7   ;;  %1744 = vperm.xlu0 %2513, %v1158_v12  }
 0x135   :  { %v3537_v0 = vpop.f32.mrf.mxu2  ;;  %v1590_v56 = vpop.permute.xlu2 %1589 }
 0x136   :  { %v1540_v34 = vpop.permute.xlu1 %1539  ;;  %v1535_v49 = vpop.permute.xlu0 %1534 }
 0x137   :  { %v1885_v52 = vmul.f32 %v1540_v34, %v3229_v45  ;;  %v1884_v43 = vmul.f32 %v1535_v49, %v3205_v40  ;;  %v771_v35 = vpop.f32.mrf.mxu0  ;;  %v851_v2 = vpop.f32.mrf.mxu1  ;;  %v1162_v40 = vld [vmem:[%s3909_s2 + $0x3b0] sm:$0xff] }
 0x138   :  { %v1831_v8 = vmul.f32 %v2944_v10, %v771_v35  ;;  %v1863_v60 = vmul.f32 %v3309_v6, %v851_v2  ;;  %v3546_v14 = vpop.f32.mrf.mxu3  ;;  %v1161_v10 = vld [vmem:[%s3909_s2 + $0x3a8] sm:$0xff] }
 0x139   :  { %2013 = vst [vmem:[%s3912_s3 + $0x248] sm:$0xff] %v1885_v52 }
 0x13a   :  { %2012 = vst [vmem:[%s3912_s3 + $0x240] sm:$0xff] %v1884_v43 }
 0x13b   :  { %1959 = vst [vmem:[%s3912_s3 + $0x98] sm:$0xff] %v1831_v8  ;;  %1769 = vperm.xlu2 %2515, %v1163_v11  }
 0x13c   :  { %1991 = vst [vmem:[%s3912_s3 + $0x198] sm:$0xff] %v1863_v60  ;;  %1764 = vperm.xlu1 %2514, %v1162_v40   ;;  %1759 = vperm.xlu0 %2513, %v1161_v10   ;;  %v1169_v10 = vld [vmem:[%s3909_s2 + $0x3e8] sm:$0xff] }
 0x13d   :  { %v931_v45 = vpop.f32.mrf.mxu2  ;;  %v3566_v6 = vpop.permute.xlu2 %1604 }
 0x13e   :  { %v1895_v36 = vmul.f32 %v1590_v56, %v931_v45  ;;  %v1555_v16 = vpop.permute.xlu1 %1554  ;;  %v1550_v23 = vpop.permute.xlu0 %1549  ;;  %v1166_v56 = vld [vmem:[%s3909_s2 + $0x3d0] sm:$0xff] }
 0x13f   :  { %v1888_v37 = vmul.f32 %v1555_v16, %v3339_v13  ;;  %v1887_v32 = vmul.f32 %v1550_v23, %v3297_v19  ;;  %v774_v5 = vpop.f32.mrf.mxu0  ;;  %v854_v7 = vpop.f32.mrf.mxu1  ;;  %v1165_v19 = vld [vmem:[%s3909_s2 + $0x3c8] sm:$0xff] }
 0x140   :  { %2023 = vst [vmem:[%s3912_s3 + $0x298] sm:$0xff] %v1895_v36  ;;  %v1832_v12 = vmul.f32 %v2859_v41, %v774_v5  ;;  %v1864_v34 = vmul.f32 %v3307_v44, %v854_v7  ;;  %v3578_v49 = vpop.f32.mrf.mxu3  ;;  %v1164_v41 = vld [vmem:[%s3909_s2 + $0x3c0] sm:$0xff] }
 0x141   :  { %2016 = vst [vmem:[%s3912_s3 + $0x260] sm:$0xff] %v1888_v37 }
 0x142   :  { %2015 = vst [vmem:[%s3912_s3 + $0x258] sm:$0xff] %v1887_v32 }
 0x143   :  { %1960 = vst [vmem:[%s3912_s3 + $0xa0] sm:$0xff] %v1832_v12  ;;  %1784 = vperm.xlu2 %2515, %v1166_v56   ;;  %v1171_v56 = vld [vmem:[%s3909_s2 + $0x3f8] sm:$0xff] }
 0x144   :  { %1992 = vst [vmem:[%s3912_s3 + $0x1a0] sm:$0xff] %v1864_v34  ;;  %1779 = vperm.xlu1 %2514, %v1165_v19   ;;  %1774 = vperm.xlu0 %2513, %v1164_v41  }
 0x145   :  { %v934_v44 = vpop.f32.mrf.mxu2  ;;  %v3598_v13 = vpop.permute.xlu2 %1619 }
 0x146   :  { %v1570_v52 = vpop.permute.xlu1 %1569  ;;  %v1565_v43 = vpop.permute.xlu0 %1564 }
 0x147   :  { %v1891_v35 = vmul.f32 %v1570_v52, %v3443_v61  ;;  %v1890_v2 = vmul.f32 %v1565_v43, %v3413_v59  ;;  %v776_v8 = vpop.f32.mrf.mxu0  ;;  %v856_v60 = vpop.f32.mrf.mxu1  ;;  %v1168_v59 = vld [vmem:[%s3909_s2 + $0x3e0] sm:$0xff] }
 0x148   :  { %v1833_v11 = vmul.f32 %v2975_v30, %v776_v8  ;;  %v1865_v40 = vmul.f32 %v3207_v20, %v856_v60  ;;  %v3607_v45 = vpop.f32.mrf.mxu3  ;;  %v1167_v30 = vld [vmem:[%s3909_s2 + $0x3d8] sm:$0xff] }
 0x149   :  { %2019 = vst [vmem:[%s3912_s3 + $0x278] sm:$0xff] %v1891_v35 }
 0x14a   :  { %2018 = vst [vmem:[%s3912_s3 + $0x270] sm:$0xff] %v1890_v2 }
 0x14b   :  { %1961 = vst [vmem:[%s3912_s3 + $0xa8] sm:$0xff] %v1833_v11  ;;  %1799 = vperm.xlu2 %2515, %v1169_v10  }
 0x14c   :  { %1993 = vst [vmem:[%s3912_s3 + $0x1a8] sm:$0xff] %v1865_v40  ;;  %1794 = vperm.xlu1 %2514, %v1168_v59   ;;  %1789 = vperm.xlu0 %2513, %v1167_v30  }
 0x14d   :  { %v936_v20 = vpop.f32.mrf.mxu2  ;;  %v3627_v61 = vpop.permute.xlu2 %1634 }
 0x14e   :  { %v1585_v36 = vpop.permute.xlu1 %1584  ;;  %v1580_v16 = vpop.permute.xlu0 %1579 }
 0x14f   :  { %v1894_v23 = vmul.f32 %v1585_v36, %v3537_v0  ;;  %v1893_v37 = vmul.f32 %v1580_v16, %v3505_v28  ;;  %v779_v32 = vpop.f32.mrf.mxu0  ;;  %v859_v5 = vpop.f32.mrf.mxu1  ;;  %v1170_v28 = vld [vmem:[%s3909_s2 + $0x3f0] sm:$0xff] }
 0x150   :  { %v1834_v7 = vmul.f32 %v2973_v29, %v779_v32  ;;  %v1866_v12 = vmul.f32 %v3345_v31, %v859_v5  ;;  %v3633_v34 = vpop.f32.mrf.mxu3 }
 0x151   :  { %2022 = vst [vmem:[%s3912_s3 + $0x290] sm:$0xff] %v1894_v23 }
 0x152   :  { %2021 = vst [vmem:[%s3912_s3 + $0x288] sm:$0xff] %v1893_v37 }
 0x153   :  { %1962 = vst [vmem:[%s3912_s3 + $0xb0] sm:$0xff] %v1834_v7 }
 0x154   :  { %1994 = vst [vmem:[%s3912_s3 + $0x1b0] sm:$0xff] %v1866_v12  ;;  %1809 = vperm.xlu1 %2514, %v1171_v56   ;;  %1804 = vperm.xlu0 %2513, %v1170_v28  }
 0x155   :  { %v939_v29 = vpop.f32.mrf.mxu2  ;;  %v3653_v31 = vpop.permute.xlu2 %1649 }
 0x156   :  { %v1898_v0 = vmul.f32 %v3566_v6, %v939_v29  ;;  %v1600_v19 = vpop.permute.xlu1 %1599  ;;  %v1595_v41 = vpop.permute.xlu0 %1594 }
 0x157   :  { %v1897_v52 = vmul.f32 %v1600_v19, %v936_v20  ;;  %v1896_v43 = vmul.f32 %v1595_v41, %v934_v44  ;;  %v781_v35 = vpop.f32.mrf.mxu0  ;;  %v861_v2 = vpop.f32.mrf.mxu1 }
 0x158   :  { %2026 = vst [vmem:[%s3912_s3 + $0x2b0] sm:$0xff] %v1898_v0  ;;  %v1835_v8 = vmul.f32 %v2889_v51, %v781_v35  ;;  %v1867_v60 = vmul.f32 %v3343_v33, %v861_v2  ;;  %v3661_v11 = vpop.f32.mrf.mxu3 }
 0x159   :  { %2025 = vst [vmem:[%s3912_s3 + $0x2a8] sm:$0xff] %v1897_v52 }
 0x15a   :  { %2024 = vst [vmem:[%s3912_s3 + $0x2a0] sm:$0xff] %v1896_v43 }
 0x15b   :  { %1963 = vst [vmem:[%s3912_s3 + $0xb8] sm:$0xff] %v1835_v8 }
 0x15c   :  { %1995 = vst [vmem:[%s3912_s3 + $0x1b8] sm:$0xff] %v1867_v60 }
 0x15d   :  { %v941_v51 = vpop.f32.mrf.mxu2  ;;  %v1665_v33 = vpop.permute.xlu2 %1664 }
 0x15e   :  { %v1910_v6 = vmul.f32 %v1665_v33, %v3017_v58  ;;  %v1615_v44 = vpop.permute.xlu1 %1614  ;;  %v1610_v40 = vpop.permute.xlu0 %1609 }
 0x15f   :  { %v1899_v10 = vmul.f32 %v1610_v40, %v941_v51  ;;  %v784_v59 = vpop.f32.mrf.mxu0  ;;  %v864_v30 = vpop.f32.mrf.mxu1 }
 0x160   :  { %2038 = vst [vmem:[%s3912_s3 + $0x310] sm:$0xff] %v1910_v6  ;;  %v1836_v20 = vmul.f32 %v3011_v48, %v784_v59  ;;  %v1868_v36 = vmul.f32 %v3231_v26, %v864_v30  ;;  %v3687_v58 = vpop.f32.mrf.mxu3 }
 0x161   :  { %2027 = vst [vmem:[%s3912_s3 + $0x2b8] sm:$0xff] %v1899_v10 }
 0x162   :  { %1964 = vst [vmem:[%s3912_s3 + $0xc0] sm:$0xff] %v1836_v20 }
 0x163   :  { %1996 = vst [vmem:[%s3912_s3 + $0x1c0] sm:$0xff] %v1868_v36 }
 0x165   :  { %v944_v16 = vpop.f32.mrf.mxu2  ;;  %v1680_v23 = vpop.permute.xlu2 %1679 }
 0x166   :  { %v1900_v37 = vmul.f32 %v1615_v44, %v944_v16  ;;  %v1913_v48 = vmul.f32 %v1680_v23, %v3112_v21  ;;  %v1630_v26 = vpop.permute.xlu1 %1629  ;;  %v1625_v32 = vpop.permute.xlu0 %1624 }
 0x167   :  { %v786_v5 = vpop.f32.mrf.mxu0  ;;  %v866_v7 = vpop.f32.mrf.mxu1 }
 0x168   :  { %2028 = vst [vmem:[%s3912_s3 + $0x2c0] sm:$0xff] %v1900_v37  ;;  %v1837_v12 = vmul.f32 %v3009_v47, %v786_v5  ;;  %v1869_v56 = vmul.f32 %v3380_v46, %v866_v7  ;;  %v3707_v21 = vpop.f32.mrf.mxu3 }
 0x169   :  { %2041 = vst [vmem:[%s3912_s3 + $0x328] sm:$0xff] %v1913_v48 }
 0x16a   :  { %1965 = vst [vmem:[%s3912_s3 + $0xc8] sm:$0xff] %v1837_v12 }
 0x16b   :  { %1997 = vst [vmem:[%s3912_s3 + $0x1c8] sm:$0xff] %v1869_v56 }
 0x16d   :  { %v946_v28 = vpop.f32.mrf.mxu2  ;;  %v1695_v29 = vpop.permute.xlu2 %1694 }
 0x16e   :  { %v1901_v47 = vmul.f32 %v3598_v13, %v946_v28  ;;  %v1916_v46 = vmul.f32 %v1695_v29, %v3215_v1  ;;  %v3711_v0 = vpop.permute.xlu1 %1644  ;;  %v3713_v19 = vpop.permute.xlu0 %1639 }
 0x16f   :  { %v789_v41 = vpop.f32.mrf.mxu0  ;;  %v869_v52 = vpop.f32.mrf.mxu1 }
 0x170   :  { %2029 = vst [vmem:[%s3912_s3 + $0x2c8] sm:$0xff] %v1901_v47  ;;  %v1838_v43 = vmul.f32 %v2905_v57, %v789_v41  ;;  %v1870_v35 = vmul.f32 %v3378_v15, %v869_v52  ;;  %v3736_v40 = vpop.f32.mrf.mxu3  ;;  %v3920_v47 = vld [vmem:[#allocation5_spill] sm:$0xff]  ;;  %v3921_v41 = vld [vmem:[#allocation4_spill] sm:$0xff] }
 0x171   :  { %2044 = vst [vmem:[%s3912_s3 + $0x340] sm:$0xff] %v1916_v46 }
 0x172   :  { %1966 = vst [vmem:[%s3912_s3 + $0xd0] sm:$0xff] %v1838_v43 }
 0x173   :  { %1998 = vst [vmem:[%s3912_s3 + $0x1d0] sm:$0xff] %v1870_v35 }
 0x175   :  { %v949_v1 = vpop.f32.mrf.mxu2  ;;  %v1710_v13 = vpop.permute.xlu2 %1709 }
 0x176   :  { %v1902_v2 = vmul.f32 %v1625_v32, %v949_v1  ;;  %v1919_v8 = vmul.f32 %v1710_v13, %v3319_v27  ;;  %v1660_v57 = vpop.permute.xlu1 %1659  ;;  %v1655_v60 = vpop.permute.xlu0 %1654  ;;  %v3922_v1 = vld [vmem:[#allocation3_spill] sm:$0xff] }
 0x177   :  { %v1909_v15 = vmul.f32 %v1660_v57, %v2989_v39  ;;  %v1908_v51 = vmul.f32 %v1655_v60, %v2954_v17  ;;  %v791_v33 = vpop.f32.mrf.mxu0  ;;  %v871_v6 = vpop.f32.mrf.mxu1 }
 0x178   :  { %2030 = vst [vmem:[%s3912_s3 + $0x2d0] sm:$0xff] %v1902_v2  ;;  %v1839_v44 = vmul.f32 %v3041_v4, %v791_v33  ;;  %v1871_v27 = vmul.f32 %v3272_v62, %v871_v6  ;;  %v3924_v33 = vld [vmem:[#allocation8_spill] sm:$0xff] }
 0x179   :  { %2047 = vst [vmem:[%s3912_s3 + $0x358] sm:$0xff] %v1919_v8 }
 0x17a   :  { %2037 = vst [vmem:[%s3912_s3 + $0x308] sm:$0xff] %v1909_v15 }
 0x17b   :  { %2036 = vst [vmem:[%s3912_s3 + $0x300] sm:$0xff] %v1908_v51 }
 0x17c   :  { %1967 = vst [vmem:[%s3912_s3 + $0xd8] sm:$0xff] %v1839_v44  ;;  %v3925_v44 = vld [vmem:[#allocation7_spill] sm:$0xff] }
 0x17d   :  { %1999 = vst [vmem:[%s3912_s3 + $0x1d8] sm:$0xff] %v1871_v27  ;;  %v951_v17 = vpop.f32.mrf.mxu2  ;;  %v1725_v39 = vpop.permute.xlu2 %1724 }
 0x17e   :  { %v1903_v4 = vmul.f32 %v1630_v26, %v951_v17  ;;  %v1922_v62 = vmul.f32 %v1725_v39, %v3429_v25  ;;  %v1675_v10 = vpop.permute.xlu1 %1674  ;;  %v1670_v59 = vpop.permute.xlu0 %1669 }
 0x17f   :  { %v1912_v30 = vmul.f32 %v1675_v10, %v3082_v42  ;;  %v1911_v20 = vmul.f32 %v1670_v59, %v3052_v18  ;;  %v794_v36 = vpop.f32.mrf.mxu0  ;;  %v874_v16 = vpop.f32.mrf.mxu1 }
 0x180   :  { %2031 = vst [vmem:[%s3912_s3 + $0x2d8] sm:$0xff] %v1903_v4  ;;  %v1840_v23 = vmul.f32 %v3039_v3, %v794_v36  ;;  %v1872_v25 = vmul.f32 %v3419_v38, %v874_v16  ;;  %v3768_v42 = vpop.f32.mrf.mxu3  ;;  %v3926_v4 = vld [vmem:[#allocation2_spill] sm:$0xff] }
 0x181   :  { %2050 = vst [vmem:[%s3912_s3 + $0x370] sm:$0xff] %v1922_v62 }
 0x182   :  { %2040 = vst [vmem:[%s3912_s3 + $0x320] sm:$0xff] %v1912_v30 }
 0x183   :  { %2039 = vst [vmem:[%s3912_s3 + $0x318] sm:$0xff] %v1911_v20 }
 0x184   :  { %1968 = vst [vmem:[%s3912_s3 + $0xe0] sm:$0xff] %v1840_v23 }
 0x185   :  { %2000 = vst [vmem:[%s3912_s3 + $0x1e0] sm:$0xff] %v1872_v25  ;;  %v954_v3 = vpop.f32.mrf.mxu2  ;;  %v1740_v18 = vpop.permute.xlu2 %1739 }
 0x186   :  { %v1904_v38 = vmul.f32 %v3627_v61, %v954_v3  ;;  %v1925_v37 = vmul.f32 %v1740_v18, %v3517_v53  ;;  %v1690_v48 = vpop.permute.xlu1 %1689  ;;  %v1685_v26 = vpop.permute.xlu0 %1684 }
 0x187   :  { %v1915_v32 = vmul.f32 %v1690_v48, %v3182_v63  ;;  %v1914_v5 = vmul.f32 %v1685_v26, %v3148_v55  ;;  %v796_v7 = vpop.f32.mrf.mxu0  ;;  %v876_v12 = vpop.f32.mrf.mxu1 }
 0x188   :  { %2032 = vst [vmem:[%s3912_s3 + $0x2e0] sm:$0xff] %v1904_v38  ;;  %v1841_v56 = vmul.f32 %v2941_v9, %v796_v7  ;;  %v1873_v53 = vmul.f32 %v3417_v54, %v876_v12  ;;  %v3800_v55 = vpop.f32.mrf.mxu3 }
 0x189   :  { %2053 = vst [vmem:[%s3912_s3 + $0x388] sm:$0xff] %v1925_v37 }
 0x18a   :  { %2043 = vst [vmem:[%s3912_s3 + $0x338] sm:$0xff] %v1915_v32 }
 0x18b   :  { %2042 = vst [vmem:[%s3912_s3 + $0x330] sm:$0xff] %v1914_v5 }
 0x18c   :  { %1969 = vst [vmem:[%s3912_s3 + $0xe8] sm:$0xff] %v1841_v56 }
 0x18d   :  { %2001 = vst [vmem:[%s3912_s3 + $0x1e8] sm:$0xff] %v1873_v53  ;;  %v956_v9 = vpop.f32.mrf.mxu2  ;;  %v1755_v63 = vpop.permute.xlu2 %1754 }
 0x18e   :  { %v1905_v54 = vmul.f32 %v3713_v19, %v956_v9  ;;  %v1928_v61 = vmul.f32 %v1755_v63, %v3607_v45  ;;  %v1705_v28 = vpop.permute.xlu1 %1704  ;;  %v1700_v29 = vpop.permute.xlu0 %1699  ;;  %v3923_v19 = vld [vmem:[#allocation6_spill] sm:$0xff] }
 0x18f   :  { %v1918_v46 = vmul.f32 %v1705_v28, %v3920_v47  ;;  %v1917_v52 = vmul.f32 %v1700_v29, %v3921_v41  ;;  %v799_v43 = vpop.f32.mrf.mxu0  ;;  %v879_v35 = vpop.f32.mrf.mxu1 }
 0x190   :  { %2033 = vst [vmem:[%s3912_s3 + $0x2e8] sm:$0xff] %v1905_v54  ;;  %v1842_v13 = vmul.f32 %v3922_v1, %v799_v43  ;;  %v1874_v45 = vmul.f32 %v3923_v19, %v879_v35 }
 0x191   :  { %2056 = vst [vmem:[%s3912_s3 + $0x3a0] sm:$0xff] %v1928_v61 }
 0x192   :  { %2046 = vst [vmem:[%s3912_s3 + $0x350] sm:$0xff] %v1918_v46 }
 0x193   :  { %2045 = vst [vmem:[%s3912_s3 + $0x348] sm:$0xff] %v1917_v52 }
 0x194   :  { %1970 = vst [vmem:[%s3912_s3 + $0xf0] sm:$0xff] %v1842_v13 }
 0x195   :  { %2002 = vst [vmem:[%s3912_s3 + $0x1f0] sm:$0xff] %v1874_v45  ;;  %v959_v2 = vpop.f32.mrf.mxu2  ;;  %v1770_v8 = vpop.permute.xlu2 %1769 }
 0x196   :  { %v1906_v57 = vmul.f32 %v3711_v0, %v959_v2  ;;  %v1931_v60 = vmul.f32 %v1770_v8, %v3687_v58  ;;  %v1720_v15 = vpop.permute.xlu1 %1719  ;;  %v1715_v51 = vpop.permute.xlu0 %1714 }
 0x197   :  { %v1921_v6 = vmul.f32 %v1720_v15, %v3924_v33  ;;  %v1920_v27 = vmul.f32 %v1715_v51, %v3925_v44  ;;  %v801_v17 = vpop.f32.mrf.mxu0  ;;  %v881_v39 = vpop.f32.mrf.mxu1 }
 0x198   :  { %2034 = vst [vmem:[%s3912_s3 + $0x2f0] sm:$0xff] %v1906_v57  ;;  %v1843_v62 = vmul.f32 %v3926_v4, %v801_v17  ;;  %v1875_v58 = vmul.f32 %v3446_v22, %v881_v39  ;;  %v1034_v0 = vpop.f32.mrf.mxu3 }
 0x199   :  { %2059 = vst [vmem:[%s3912_s3 + $0x3b8] sm:$0xff] %v1931_v60 }
 0x19a   :  { %2049 = vst [vmem:[%s3912_s3 + $0x368] sm:$0xff] %v1921_v6 }
 0x19b   :  { %2048 = vst [vmem:[%s3912_s3 + $0x360] sm:$0xff] %v1920_v27 }
 0x19c   :  { %1971 = vst [vmem:[%s3912_s3 + $0xf8] sm:$0xff] %v1843_v62 }
 0x19d   :  { %2003 = vst [vmem:[%s3912_s3 + $0x1f8] sm:$0xff] %v1875_v58  ;;  %v961_v10 = vpop.f32.mrf.mxu2  ;;  %v1785_v59 = vpop.permute.xlu2 %1784 }
 0x19e   :  { %v1907_v22 = vmul.f32 %v3653_v31, %v961_v10  ;;  %v1934_v30 = vmul.f32 %v1785_v59, %v3768_v42  ;;  %v1735_v20 = vpop.permute.xlu1 %1734  ;;  %v1730_v36 = vpop.permute.xlu0 %1729 }
 0x19f   :  { %v1924_v16 = vmul.f32 %v1735_v20, %v3485_v24  ;;  %v1923_v23 = vmul.f32 %v1730_v36, %v3457_v50 }
 0x1a0   :  { %2035 = vst [vmem:[%s3912_s3 + $0x2f8] sm:$0xff] %v1907_v22  ;;  %v1036_v31 = vpop.f32.mrf.mxu3 }
 0x1a1   :  { %2062 = vst [vmem:[%s3912_s3 + $0x3d0] sm:$0xff] %v1934_v30 }
 0x1a2   :  { %2052 = vst [vmem:[%s3912_s3 + $0x380] sm:$0xff] %v1924_v16 }
 0x1a3   :  { %2051 = vst [vmem:[%s3912_s3 + $0x378] sm:$0xff] %v1923_v23 }
 0x1a5   :  { %v1800_v24 = vpop.permute.xlu2 %1799 }
 0x1a6   :  { %v1750_v25 = vpop.permute.xlu1 %1749  ;;  %v1745_v50 = vpop.permute.xlu0 %1744  ;;  %v1937_v42 = vmul.f32 %v1800_v24, %v1036_v31 }
 0x1a7   :  { %v1927_v3 = vmul.f32 %v1750_v25, %v3578_v49  ;;  %v1926_v18 = vmul.f32 %v1745_v50, %v3546_v14 }
 0x1a8   :  { %2065 = vst [vmem:[%s3912_s3 + $0x3e8] sm:$0xff] %v1937_v42 }
 0x1a9   :  { %2055 = vst [vmem:[%s3912_s3 + $0x398] sm:$0xff] %v1927_v3 }
 0x1aa   :  { %2054 = vst [vmem:[%s3912_s3 + $0x390] sm:$0xff] %v1926_v18 }
 0x1ae   :  { %v1765_v38 = vpop.permute.xlu1 %1764  ;;  %v1760_v37 = vpop.permute.xlu0 %1759 }
 0x1af   :  { %v1930_v48 = vmul.f32 %v1765_v38, %v3661_v11  ;;  %v1929_v49 = vmul.f32 %v1760_v37, %v3633_v34  ;;  %v1039_v34 = vpop.f32.mrf.mxu3 }
 0x1b1   :  { %2058 = vst [vmem:[%s3912_s3 + $0x3b0] sm:$0xff] %v1930_v48 }
 0x1b2   :  { %2057 = vst [vmem:[%s3912_s3 + $0x3a8] sm:$0xff] %v1929_v49 }
 0x1b6   :  { %v1780_v14 = vpop.permute.xlu1 %1779  ;;  %v1775_v26 = vpop.permute.xlu0 %1774 }
 0x1b7   :  { %v1933_v32 = vmul.f32 %v1780_v14, %v3736_v40  ;;  %v1932_v5 = vmul.f32 %v1775_v26, %v3707_v21  ;;  %v1041_v21 = vpop.f32.mrf.mxu3 }
 0x1b9   :  { %2061 = vst [vmem:[%s3912_s3 + $0x3c8] sm:$0xff] %v1933_v32 }
 0x1ba   :  { %2060 = vst [vmem:[%s3912_s3 + $0x3c0] sm:$0xff] %v1932_v5 }
 0x1be   :  { %v1795_v11 = vpop.permute.xlu1 %1794  ;;  %v1790_v7 = vpop.permute.xlu0 %1789 }
 0x1bf   :  { %v1936_v12 = vmul.f32 %v1795_v11, %v1034_v0  ;;  %v1935_v56 = vmul.f32 %v1790_v7, %v3800_v55 }
 0x1c1   :  { %2064 = vst [vmem:[%s3912_s3 + $0x3e0] sm:$0xff] %v1936_v12 }
 0x1c2   :  { %2063 = vst [vmem:[%s3912_s3 + $0x3d8] sm:$0xff] %v1935_v56 }
 0x1c6   :  { %v1810_v40 = vpop.permute.xlu1 %1809  ;;  %v1805_v53 = vpop.permute.xlu0 %1804 }
 0x1c7   :  { %v1939_v9 = vmul.f32 %v1810_v40, %v1041_v21  ;;  %v1938_v63 = vmul.f32 %v1805_v53, %v1039_v34 }
 0x1c9   :  { %2067 = vst [vmem:[%s3912_s3 + $0x3f8] sm:$0xff] %v1939_v9 }
 0x1ca   :  { %2066 = vst [vmem:[%s3912_s3 + $0x3f0] sm:$0xff] %v1938_v63 }

// kernel: sconv3d_forward.3
= control target key start
LH: loop header
LB: loop body
LE: loop exit
PB: predicated region body
PF: predicated region fallthrough
CT: control target
= control target key end

     0   :  { %vm179_vm0 = vcmask 1043456   ;;  %vm82_vm1 = vcmask 31744   ;;  %s822_s2 = inlined_call_operand.vmem [shape: f32[4,128], index: 2, kind: input, shape index: {}]   ;;  %s823_s1 = inlined_call_operand.vmem [shape: f32[256,4], index: 1, kind: input, shape index: {}]   ;;  %s824_s3 = inlined_call_operand.vmem [shape: f32[1,128], index: 3, kind: input, shape index: {}]   ;;  %s825_s0 = inlined_call_operand.vmem [shape: f32[256,128], index: 0, kind: input, shape index: {}]   ;;  %s826_s4 = inlined_call_operand.vmem [shape: f32[256,128], index: 4, kind: output, shape index: {}]  }
   0x1   :  { %v81_v0 = vld [vmem:[%s822_s2] sm:$0xf]  ;;  %v66_v5 = vld [vmem:[%s823_s1 + $0x88] sm:$0xff]  ;;  %v67_v9 = vld [vmem:[%s823_s1 + $0x90] sm:$0xff] }
   0x2   :  { %v65_v1 = vld [vmem:[%s823_s1 + $0x80] sm:$0xff]  ;;  %434 = vmatpush.msk.msra.mxu2 %vm179_vm0, %v81_v0  ;;  %435 = vmatpush.msk.msra.mxu3 %vm179_vm0, %v81_v0  ;;  %v74_v6 = vld [vmem:[%s823_s1 + $0xc8] sm:$0xff]  ;;  %v75_v10 = vld [vmem:[%s823_s1 + $0xd0] sm:$0xff] }
   0x3   :  { %v73_v2 = vld [vmem:[%s823_s1 + $0xc0] sm:$0xff]  ;;  %417 = vmatmul.msk.f32.vlgmr.msra.gmra.mxu2 %vm82_vm1, %v65_v1  ;;  %400 = vmatpush.msk.msra.mxu0 %vm179_vm0, %v81_v0  ;;  %v50_v7 = vld [vmem:[%s823_s1 + $0x8] sm:$0xff]  ;;  %v51_v11 = vld [vmem:[%s823_s1 + $0x10] sm:$0xff] }
   0x4   :  { %v49_v3 = vld [vmem:[%s823_s1] sm:$0xff]  ;;  %425 = vmatmul.msk.f32.vlgmr.msra.gmra.mxu3 %vm82_vm1, %v73_v2  ;;  %433 = vmatpush.msk.msra.mxu1 %vm179_vm0, %v81_v0  ;;  %v58_v8 = vld [vmem:[%s823_s1 + $0x48] sm:$0xff]  ;;  %v59_v12 = vld [vmem:[%s823_s1 + $0x50] sm:$0xff] }
   0x5   :  { %v57_v4 = vld [vmem:[%s823_s1 + $0x40] sm:$0xff]  ;;  %401 = vmatmul.msk.f32.vlgmr.msra.gmra.mxu0 %vm82_vm1, %v49_v3  ;;  %v68_v13 = vld [vmem:[%s823_s1 + $0x98] sm:$0xff]  ;;  %v70_v21 = vld [vmem:[%s823_s1 + $0xa8] sm:$0xff] }
   0x6   :  { %409 = vmatmul.msk.f32.vlgmr.msra.gmra.mxu1 %vm82_vm1, %v57_v4  ;;  %v76_v14 = vld [vmem:[%s823_s1 + $0xd8] sm:$0xff]  ;;  %v69_v17 = vld [vmem:[%s823_s1 + $0xa0] sm:$0xff]  ;;  %v78_v22 = vld [vmem:[%s823_s1 + $0xe8] sm:$0xff] }
   0x7   :  { %v52_v15 = vld [vmem:[%s823_s1 + $0x18] sm:$0xff]  ;;  %v77_v18 = vld [vmem:[%s823_s1 + $0xe0] sm:$0xff]  ;;  %v54_v23 = vld [vmem:[%s823_s1 + $0x28] sm:$0xff] }
   0x8   :  { %v60_v16 = vld [vmem:[%s823_s1 + $0x58] sm:$0xff]  ;;  %v53_v19 = vld [vmem:[%s823_s1 + $0x20] sm:$0xff]  ;;  %v62_v24 = vld [vmem:[%s823_s1 + $0x68] sm:$0xff] }
   0x9   :  { %v61_v20 = vld [vmem:[%s823_s1 + $0x60] sm:$0xff]  ;;  %v71_v25 = vld [vmem:[%s823_s1 + $0xb0] sm:$0xff]  ;;  %v72_v29 = vld [vmem:[%s823_s1 + $0xb8] sm:$0xff] }
   0xa   :  { %v79_v26 = vld [vmem:[%s823_s1 + $0xf0] sm:$0xff]  ;;  %v80_v30 = vld [vmem:[%s823_s1 + $0xf8] sm:$0xff]  ;;  %v17_v33 = vld [vmem:[%s825_s0] sm:$0xff] }
   0xb   :  { %418 = vmatmul.msk.f32.gmra.mxu2 %vm82_vm1, %v66_v5  ;;  %v55_v27 = vld [vmem:[%s823_s1 + $0x30] sm:$0xff]  ;;  %v56_v31 = vld [vmem:[%s823_s1 + $0x38] sm:$0xff]  ;;  %v25_v34 = vld [vmem:[%s825_s0 + $0x40] sm:$0xff] }
   0xc   :  { %426 = vmatmul.msk.f32.gmra.mxu3 %vm82_vm1, %v74_v6  ;;  %v63_v28 = vld [vmem:[%s823_s1 + $0x70] sm:$0xff]  ;;  %v64_v32 = vld [vmem:[%s823_s1 + $0x78] sm:$0xff]  ;;  %v602_v35 = vld [vmem:[%s824_s3] ss:$0 sm:$0xff] }
   0xd   :  { %402 = vmatmul.msk.f32.gmra.mxu0 %vm82_vm1, %v50_v7  ;;  %v33_v40 = vld [vmem:[%s825_s0 + $0x80] sm:$0xff]  ;;  %v18_v48 = vld [vmem:[%s825_s0 + $0x8] sm:$0xff]  ;;  %v19_v0 = vld [vmem:[%s825_s0 + $0x10] sm:$0xff] }
   0xe   :  { %410 = vmatmul.msk.f32.gmra.mxu1 %vm82_vm1, %v58_v8  ;;  %v41_v41 = vld [vmem:[%s825_s0 + $0xc0] sm:$0xff]  ;;  %v26_v49 = vld [vmem:[%s825_s0 + $0x48] sm:$0xff]  ;;  %v27_v1 = vld [vmem:[%s825_s0 + $0x50] sm:$0xff] }
   0xf   :  { %v34_v56 = vld [vmem:[%s825_s0 + $0x88] sm:$0xff]  ;;  %v35_v8 = vld [vmem:[%s825_s0 + $0x90] sm:$0xff] }
  0x10   :  { %v42_v57 = vld [vmem:[%s825_s0 + $0xc8] sm:$0xff] }
  0x13   :  { %419 = vmatmul.msk.f32.gmra.mxu2 %vm82_vm1, %v67_v9  ;;  %v43_v9 = vld [vmem:[%s825_s0 + $0xd0] sm:$0xff] }
  0x14   :  { %427 = vmatmul.msk.f32.gmra.mxu3 %vm82_vm1, %v75_v10 }
  0x15   :  { %403 = vmatmul.msk.f32.gmra.mxu0 %vm82_vm1, %v51_v11 }
  0x16   :  { %411 = vmatmul.msk.f32.gmra.mxu1 %vm82_vm1, %v59_v12 }
  0x1b   :  { %420 = vmatmul.msk.f32.gmra.mxu2 %vm82_vm1, %v68_v13 }
  0x1c   :  { %428 = vmatmul.msk.f32.gmra.mxu3 %vm82_vm1, %v76_v14 }
  0x1d   :  { %404 = vmatmul.msk.f32.gmra.mxu0 %vm82_vm1, %v52_v15 }
  0x1e   :  { %412 = vmatmul.msk.f32.gmra.mxu1 %vm82_vm1, %v60_v16  ;;  %v20_v16 = vld [vmem:[%s825_s0 + $0x18] sm:$0xff] }
  0x23   :  { %421 = vmatmul.msk.f32.gmra.mxu2 %vm82_vm1, %v69_v17  ;;  %v28_v17 = vld [vmem:[%s825_s0 + $0x58] sm:$0xff] }
  0x24   :  { %429 = vmatmul.msk.f32.gmra.mxu3 %vm82_vm1, %v77_v18 }
  0x25   :  { %405 = vmatmul.msk.f32.gmra.mxu0 %vm82_vm1, %v53_v19 }
  0x26   :  { %413 = vmatmul.msk.f32.gmra.mxu1 %vm82_vm1, %v61_v20 }
  0x2b   :  { %422 = vmatmul.msk.f32.gmra.mxu2 %vm82_vm1, %v70_v21 }
  0x2c   :  { %430 = vmatmul.msk.f32.gmra.mxu3 %vm82_vm1, %v78_v22 }
  0x2d   :  { %406 = vmatmul.msk.f32.gmra.mxu0 %vm82_vm1, %v54_v23 }
  0x2e   :  { %414 = vmatmul.msk.f32.gmra.mxu1 %vm82_vm1, %v62_v24  ;;  %v36_v24 = vld [vmem:[%s825_s0 + $0x98] sm:$0xff] }
  0x33   :  { %423 = vmatmul.msk.f32.gmra.mxu2 %vm82_vm1, %v71_v25  ;;  %v44_v25 = vld [vmem:[%s825_s0 + $0xd8] sm:$0xff] }
  0x34   :  { %431 = vmatmul.msk.f32.gmra.mxu3 %vm82_vm1, %v79_v26 }
  0x35   :  { %407 = vmatmul.msk.f32.gmra.mxu0 %vm82_vm1, %v55_v27 }
  0x36   :  { %415 = vmatmul.msk.f32.gmra.mxu1 %vm82_vm1, %v63_v28 }
  0x3b   :  { %424 = vmatmul.msk.f32.gmra.mxu2 %vm82_vm1, %v72_v29 }
  0x3c   :  { %432 = vmatmul.msk.f32.gmra.mxu3 %vm82_vm1, %v80_v30 }
  0x3d   :  { %408 = vmatmul.msk.f32.gmra.mxu0 %vm82_vm1, %v56_v31 }
  0x3e   :  { %416 = vmatmul.msk.f32.gmra.mxu1 %vm82_vm1, %v64_v32  ;;  %v21_v32 = vld [vmem:[%s825_s0 + $0x20] sm:$0xff] }
  0x82   :  { %v200_v36 = vpop.f32.mrf.mxu0 }
  0x83   :  { %v224_v37 = vpop.f32.mrf.mxu1  ;;  %v296_v38 = vadd.f32 %v200_v36, %v17_v33  ;;  %v29_v33 = vld [vmem:[%s825_s0 + $0x60] sm:$0xff] }
  0x84   :  { %v304_v39 = vadd.f32 %v224_v37, %v25_v34 }
  0x85   :  { %v332_v42 = vadd.f32 %v602_v35, %v296_v38 }
  0x86   :  { %v340_v43 = vadd.f32 %v602_v35, %v304_v39  ;;  %v248_v44 = vpop.f32.mrf.mxu2 }
  0x87   :  { %v272_v45 = vpop.f32.mrf.mxu3  ;;  %364 = vst [vmem:[%s826_s4] sm:$0xff] %v332_v42  ;;  %v312_v46 = vadd.f32 %v248_v44, %v33_v40  ;;  %v45_v42 = vld [vmem:[%s825_s0 + $0xe0] sm:$0xff] }
  0x88   :  { %v320_v47 = vadd.f32 %v272_v45, %v41_v41  ;;  %372 = vst [vmem:[%s826_s4 + $0x40] sm:$0xff] %v340_v43  ;;  %v37_v41 = vld [vmem:[%s825_s0 + $0xa0] sm:$0xff] }
  0x89   :  { %v348_v50 = vadd.f32 %v602_v35, %v312_v46 }
  0x8a   :  { %v356_v51 = vadd.f32 %v602_v35, %v320_v47  ;;  %v203_v52 = vpop.f32.mrf.mxu0 }
  0x8b   :  { %v227_v53 = vpop.f32.mrf.mxu1  ;;  %380 = vst [vmem:[%s826_s4 + $0x80] sm:$0xff] %v348_v50  ;;  %v297_v54 = vadd.f32 %v203_v52, %v18_v48  ;;  %v30_v50 = vld [vmem:[%s825_s0 + $0x68] sm:$0xff] }
  0x8c   :  { %v305_v55 = vadd.f32 %v227_v53, %v26_v49  ;;  %388 = vst [vmem:[%s826_s4 + $0xc0] sm:$0xff] %v356_v51  ;;  %v22_v49 = vld [vmem:[%s825_s0 + $0x28] sm:$0xff] }
  0x8d   :  { %v333_v58 = vadd.f32 %v602_v35, %v297_v54 }
  0x8e   :  { %v341_v59 = vadd.f32 %v602_v35, %v305_v55  ;;  %v251_v60 = vpop.f32.mrf.mxu2 }
  0x8f   :  { %v275_v61 = vpop.f32.mrf.mxu3  ;;  %365 = vst [vmem:[%s826_s4 + $0x8] sm:$0xff] %v333_v58  ;;  %v313_v62 = vadd.f32 %v251_v60, %v34_v56  ;;  %v46_v58 = vld [vmem:[%s825_s0 + $0xe8] sm:$0xff] }
  0x90   :  { %v321_v63 = vadd.f32 %v275_v61, %v42_v57  ;;  %373 = vst [vmem:[%s826_s4 + $0x48] sm:$0xff] %v341_v59  ;;  %v38_v57 = vld [vmem:[%s825_s0 + $0xa8] sm:$0xff] }
  0x91   :  { %v349_v2 = vadd.f32 %v602_v35, %v313_v62 }
  0x92   :  { %v357_v3 = vadd.f32 %v602_v35, %v321_v63  ;;  %v206_v4 = vpop.f32.mrf.mxu0 }
  0x93   :  { %v230_v5 = vpop.f32.mrf.mxu1  ;;  %381 = vst [vmem:[%s826_s4 + $0x88] sm:$0xff] %v349_v2  ;;  %v298_v6 = vadd.f32 %v206_v4, %v19_v0  ;;  %v31_v2 = vld [vmem:[%s825_s0 + $0x70] sm:$0xff] }
  0x94   :  { %v306_v7 = vadd.f32 %v230_v5, %v27_v1  ;;  %389 = vst [vmem:[%s826_s4 + $0xc8] sm:$0xff] %v357_v3  ;;  %v23_v1 = vld [vmem:[%s825_s0 + $0x30] sm:$0xff] }
  0x95   :  { %v334_v10 = vadd.f32 %v602_v35, %v298_v6 }
  0x96   :  { %v342_v11 = vadd.f32 %v602_v35, %v306_v7  ;;  %v254_v12 = vpop.f32.mrf.mxu2 }
  0x97   :  { %v278_v13 = vpop.f32.mrf.mxu3  ;;  %366 = vst [vmem:[%s826_s4 + $0x10] sm:$0xff] %v334_v10  ;;  %v314_v14 = vadd.f32 %v254_v12, %v35_v8  ;;  %v47_v10 = vld [vmem:[%s825_s0 + $0xf0] sm:$0xff] }
  0x98   :  { %v322_v15 = vadd.f32 %v278_v13, %v43_v9  ;;  %374 = vst [vmem:[%s826_s4 + $0x50] sm:$0xff] %v342_v11  ;;  %v39_v9 = vld [vmem:[%s825_s0 + $0xb0] sm:$0xff] }
  0x99   :  { %v350_v18 = vadd.f32 %v602_v35, %v314_v14 }
  0x9a   :  { %v358_v19 = vadd.f32 %v602_v35, %v322_v15  ;;  %v209_v20 = vpop.f32.mrf.mxu0 }
  0x9b   :  { %v233_v21 = vpop.f32.mrf.mxu1  ;;  %382 = vst [vmem:[%s826_s4 + $0x90] sm:$0xff] %v350_v18  ;;  %v299_v22 = vadd.f32 %v209_v20, %v20_v16  ;;  %v32_v18 = vld [vmem:[%s825_s0 + $0x78] sm:$0xff] }
  0x9c   :  { %v307_v23 = vadd.f32 %v233_v21, %v28_v17  ;;  %390 = vst [vmem:[%s826_s4 + $0xd0] sm:$0xff] %v358_v19  ;;  %v24_v17 = vld [vmem:[%s825_s0 + $0x38] sm:$0xff] }
  0x9d   :  { %v335_v26 = vadd.f32 %v602_v35, %v299_v22 }
  0x9e   :  { %v343_v27 = vadd.f32 %v602_v35, %v307_v23  ;;  %v257_v28 = vpop.f32.mrf.mxu2 }
  0x9f   :  { %v281_v29 = vpop.f32.mrf.mxu3  ;;  %367 = vst [vmem:[%s826_s4 + $0x18] sm:$0xff] %v335_v26  ;;  %v315_v30 = vadd.f32 %v257_v28, %v36_v24  ;;  %v48_v26 = vld [vmem:[%s825_s0 + $0xf8] sm:$0xff] }
  0xa0   :  { %v323_v31 = vadd.f32 %v281_v29, %v44_v25  ;;  %375 = vst [vmem:[%s826_s4 + $0x58] sm:$0xff] %v343_v27  ;;  %v40_v25 = vld [vmem:[%s825_s0 + $0xb8] sm:$0xff] }
  0xa1   :  { %v351_v34 = vadd.f32 %v602_v35, %v315_v30 }
  0xa2   :  { %v359_v36 = vadd.f32 %v602_v35, %v323_v31  ;;  %v212_v37 = vpop.f32.mrf.mxu0 }
  0xa3   :  { %v236_v38 = vpop.f32.mrf.mxu1  ;;  %383 = vst [vmem:[%s826_s4 + $0x98] sm:$0xff] %v351_v34  ;;  %v300_v39 = vadd.f32 %v212_v37, %v21_v32 }
  0xa4   :  { %v308_v40 = vadd.f32 %v236_v38, %v29_v33  ;;  %391 = vst [vmem:[%s826_s4 + $0xd8] sm:$0xff] %v359_v36 }
  0xa5   :  { %v336_v43 = vadd.f32 %v602_v35, %v300_v39 }
  0xa6   :  { %v344_v44 = vadd.f32 %v602_v35, %v308_v40  ;;  %v260_v45 = vpop.f32.mrf.mxu2 }
  0xa7   :  { %v284_v46 = vpop.f32.mrf.mxu3  ;;  %368 = vst [vmem:[%s826_s4 + $0x20] sm:$0xff] %v336_v43  ;;  %v316_v47 = vadd.f32 %v260_v45, %v37_v41 }
  0xa8   :  { %v324_v48 = vadd.f32 %v284_v46, %v45_v42  ;;  %376 = vst [vmem:[%s826_s4 + $0x60] sm:$0xff] %v344_v44 }
  0xa9   :  { %v352_v51 = vadd.f32 %v602_v35, %v316_v47 }
  0xaa   :  { %v360_v52 = vadd.f32 %v602_v35, %v324_v48  ;;  %v215_v53 = vpop.f32.mrf.mxu0 }
  0xab   :  { %v239_v54 = vpop.f32.mrf.mxu1  ;;  %384 = vst [vmem:[%s826_s4 + $0xa0] sm:$0xff] %v352_v51  ;;  %v301_v55 = vadd.f32 %v215_v53, %v22_v49 }
  0xac   :  { %v309_v56 = vadd.f32 %v239_v54, %v30_v50  ;;  %392 = vst [vmem:[%s826_s4 + $0xe0] sm:$0xff] %v360_v52 }
  0xad   :  { %v337_v59 = vadd.f32 %v602_v35, %v301_v55 }
  0xae   :  { %v345_v60 = vadd.f32 %v602_v35, %v309_v56  ;;  %v263_v61 = vpop.f32.mrf.mxu2 }
  0xaf   :  { %v287_v62 = vpop.f32.mrf.mxu3  ;;  %369 = vst [vmem:[%s826_s4 + $0x28] sm:$0xff] %v337_v59  ;;  %v317_v63 = vadd.f32 %v263_v61, %v38_v57 }
  0xb0   :  { %v325_v0 = vadd.f32 %v287_v62, %v46_v58  ;;  %377 = vst [vmem:[%s826_s4 + $0x68] sm:$0xff] %v345_v60 }
  0xb1   :  { %v353_v3 = vadd.f32 %v602_v35, %v317_v63 }
  0xb2   :  { %v361_v4 = vadd.f32 %v602_v35, %v325_v0  ;;  %v218_v5 = vpop.f32.mrf.mxu0 }
  0xb3   :  { %v242_v6 = vpop.f32.mrf.mxu1  ;;  %385 = vst [vmem:[%s826_s4 + $0xa8] sm:$0xff] %v353_v3  ;;  %v302_v7 = vadd.f32 %v218_v5, %v23_v1 }
  0xb4   :  { %v310_v8 = vadd.f32 %v242_v6, %v31_v2  ;;  %393 = vst [vmem:[%s826_s4 + $0xe8] sm:$0xff] %v361_v4 }
  0xb5   :  { %v338_v11 = vadd.f32 %v602_v35, %v302_v7 }
  0xb6   :  { %v346_v12 = vadd.f32 %v602_v35, %v310_v8  ;;  %v266_v13 = vpop.f32.mrf.mxu2 }
  0xb7   :  { %v290_v14 = vpop.f32.mrf.mxu3  ;;  %370 = vst [vmem:[%s826_s4 + $0x30] sm:$0xff] %v338_v11  ;;  %v318_v15 = vadd.f32 %v266_v13, %v39_v9 }
  0xb8   :  { %v326_v16 = vadd.f32 %v290_v14, %v47_v10  ;;  %378 = vst [vmem:[%s826_s4 + $0x70] sm:$0xff] %v346_v12 }
  0xb9   :  { %v354_v19 = vadd.f32 %v602_v35, %v318_v15 }
  0xba   :  { %v362_v20 = vadd.f32 %v602_v35, %v326_v16  ;;  %v221_v21 = vpop.f32.mrf.mxu0 }
  0xbb   :  { %v245_v22 = vpop.f32.mrf.mxu1  ;;  %386 = vst [vmem:[%s826_s4 + $0xb0] sm:$0xff] %v354_v19  ;;  %v303_v23 = vadd.f32 %v221_v21, %v24_v17 }
  0xbc   :  { %v311_v24 = vadd.f32 %v245_v22, %v32_v18  ;;  %394 = vst [vmem:[%s826_s4 + $0xf0] sm:$0xff] %v362_v20 }
  0xbd   :  { %v339_v27 = vadd.f32 %v602_v35, %v303_v23 }
  0xbe   :  { %v347_v28 = vadd.f32 %v602_v35, %v311_v24  ;;  %v269_v29 = vpop.f32.mrf.mxu2 }
  0xbf   :  { %v293_v30 = vpop.f32.mrf.mxu3  ;;  %371 = vst [vmem:[%s826_s4 + $0x38] sm:$0xff] %v339_v27  ;;  %v319_v31 = vadd.f32 %v269_v29, %v40_v25 }
  0xc0   :  { %v327_v32 = vadd.f32 %v293_v30, %v48_v26  ;;  %379 = vst [vmem:[%s826_s4 + $0x78] sm:$0xff] %v347_v28 }
  0xc1   :  { %v355_v33 = vadd.f32 %v602_v35, %v319_v31 }
  0xc2   :  { %v363_v34 = vadd.f32 %v602_v35, %v327_v32 }
  0xc3   :  { %387 = vst [vmem:[%s826_s4 + $0xb8] sm:$0xff] %v355_v33 }
  0xc4   :  { %395 = vst [vmem:[%s826_s4 + $0xf8] sm:$0xff] %v363_v34 }

</bundles_post_ra>
